<compile_context>
chip_gen: v5e
topology: v5e:2x2
jax: 0.10.0
libtpu: 0.0.40
codegen_flags: <defaults>
</compile_context>

<pallas_src>
import functools
import math

import jax
import jax.numpy as jnp
from jax import lax
from jax.experimental import pallas as pl
from jax.experimental.pallas import tpu as pltpu


# ----------------------------------------------------------------------------
# Small helpers used inside the kernel
# ----------------------------------------------------------------------------
def _layer_norm(x, g, b, eps=1e-5):
    # PyTorch nn.LayerNorm: biased variance, eps inside sqrt.
    mu = jnp.mean(x, axis=-1, keepdims=True)
    var = jnp.mean((x - mu) ** 2, axis=-1, keepdims=True)
    return (x - mu) * lax.rsqrt(var + eps) * g + b


def _gelu_exact(x):
    # PyTorch nn.GELU() default = exact erf-based GELU.
    return 0.5 * x * (1.0 + lax.erf(x * 0.7071067811865476))


# ----------------------------------------------------------------------------
# The Pallas kernel: one batch *block* per grid step, everything in VMEM.
# ----------------------------------------------------------------------------
def _crosstalk_kernel(eig_ref, feat_ref,
                      ln_g_ref, ln_b_ref,
                      qkv_w_ref, qkv_b_ref,
                      out_w_ref, out_b_ref,
                      d_w_ref, d_b_ref,
                      ef_w1_ref, ef_w2_ref, ef_b_ref,
                      ff_w1_ref, ff_w2_ref, ff_b_ref,
                      out_ref,
                      od_scr,
                      *, num_heads):
    Bb, S, E = eig_ref.shape           # batch block, seq, embed
    L = 2 * S                          # concat'd sequence length
    BL = Bb * L
    BS = Bb * S
    H = num_heads
    Dh = E // H
    Eh = E // 2
    f32 = jnp.float32

    ln_g = ln_g_ref[...]               # (4, E)
    ln_b = ln_b_ref[...]               # (4, E)

    eig = eig_ref[...]                 # (Bb, S, E)
    feat = feat_ref[...]               # (Bb, S, E)

    # ---- eig_mha_norm / feat_mha_norm --------------------------------------
    eig_n = _layer_norm(eig, ln_g[0:1, :], ln_b[0:1, :])      # (Bb, S, E)
    feat_n = _layer_norm(feat, ln_g[1:2, :], ln_b[1:2, :])    # (Bb, S, E)

    # ---- h = cat((eig, feat), dim=1), flattened to a (Bb*2S, E) slab --------
    h2 = jnp.concatenate([eig_n, feat_n], axis=1).reshape(BL, E)

    # ---- fused QKV projection (attention scale pre-folded into q weights) ---
    qkv2 = jnp.dot(h2, qkv_w_ref[...], preferred_element_type=f32) + qkv_b_ref[...]
    qkv3 = qkv2.reshape(Bb, L, 3 * E)                          # (Bb, L, 3E)

    # ---- heads folded into the batch dimension: (H*Bb, L, Dh) ---------------
    qb = jnp.concatenate(
        [qkv3[:, :, hd * Dh:(hd + 1) * Dh] for hd in range(H)], axis=0)
    kb = jnp.concatenate(
        [qkv3[:, :, E + hd * Dh:E + (hd + 1) * Dh] for hd in range(H)], axis=0)
    vb = jnp.concatenate(
        [qkv3[:, :, 2 * E + hd * Dh:2 * E + (hd + 1) * Dh] for hd in range(H)], axis=0)

    # ---- single batched attention: scores / softmax / weighted values -------
    s = lax.dot_general(qb, kb, (((2,), (2,)), ((0,), (0,))),
                        preferred_element_type=f32)            # (H*Bb, L, L)
    s = s - jnp.max(s, axis=-1, keepdims=True)
    p = jnp.exp(s)
    p = p * pl.reciprocal(jnp.sum(p, axis=-1, keepdims=True), approx=True)
    o = lax.dot_general(p, vb, (((2,), (1,)), ((0,), (0,))),
                        preferred_element_type=f32)            # (H*Bb, L, Dh)

    # reassemble heads along the embedding dimension -> (Bb*L, E)
    attn2 = jnp.concatenate(
        [o[hd * Bb:(hd + 1) * Bb] for hd in range(H)], axis=-1).reshape(BL, E)

    # ---- out_proj + fused dense1|dense2 -------------------------------------
    attn2 = jnp.dot(attn2, out_w_ref[...], preferred_element_type=f32) + out_b_ref[...]
    od = jnp.dot(attn2, d_w_ref[...], preferred_element_type=f32) + d_b_ref[...]

    # ---- reshape_as(cross): pair consecutive rows (2i, 2i+1) -----------------
    # Done with strided sublane loads from a VMEM scratch (no selection-matrix
    # matmuls).  Columns [:E/2] are dense1 output, [E/2:] are dense2 output.
    od_scr[...] = od                                           # (BL, E)
    ev = od_scr[pl.ds(0, BS, stride=2), :]                     # rows 0,2,4,...
    od1 = od_scr[pl.ds(1, BS, stride=2), :]                    # rows 1,3,5,...
    mha_eig = jnp.concatenate([ev[:, :Eh], od1[:, :Eh]], axis=1)    # (BS, E)
    mha_feat = jnp.concatenate([ev[:, Eh:], od1[:, Eh:]], axis=1)   # (BS, E)

    # residual add (dropout = identity in eval mode)
    x_e = eig_n.reshape(BS, E) + mha_eig
    x_f = feat_n.reshape(BS, E) + mha_feat

    # ---- ResidualFeedForward -------------------------------------------------
    def _residual_ffn(x, g, b, w1, w2, bb):
        xn = _layer_norm(x, g, b)
        y = jnp.dot(xn, w1, preferred_element_type=f32) + bb[0:1, :]
        y = _gelu_exact(y)
        y = jnp.dot(y, w2, preferred_element_type=f32) + bb[1:2, :]
        return x + y                                           # dropout = identity

    # single merged output slab: row 0 = eig stream, row 1 = feat stream
    out_ref[0] = _residual_ffn(x_e, ln_g[2:3, :], ln_b[2:3, :],
                               ef_w1_ref[...], ef_w2_ref[...], ef_b_ref[...])
    out_ref[1] = _residual_ffn(x_f, ln_g[3:4, :], ln_b[3:4, :],
                               ff_w1_ref[...], ff_w2_ref[...], ff_b_ref[...])


# ----------------------------------------------------------------------------
# Host-side wrapper
# ----------------------------------------------------------------------------
KERNEL_PARAM_ORDER = ['ln_g', 'ln_b',
                      'qkv_w', 'qkv_b',
                      'out_w', 'out_b',
                      'd_w', 'd_b',
                      'eig_ffn_w1', 'eig_ffn_w2', 'eig_ffn_b',
                      'feat_ffn_w1', 'feat_ffn_w2', 'feat_ffn_b']


def crosstalk_transformer(eig, feat, packed, num_heads, *, batch_block=None):
    """eig, feat: (B, S, E) f32.  packed: output of pack_params()."""
    B, S, E = eig.shape
    assert feat.shape == (B, S, E)
    assert E % 2 == 0 and E % num_heads == 0
    if batch_block is None:
        batch_block = B            # one fused grid step (best on 1-TC chips).
                                   # On v7x use batch_block = B // 2 to use both TCs.
    assert B % batch_block == 0
    grid = (B // batch_block,)

    params = [packed[n] for n in KERNEL_PARAM_ORDER]

    def full_spec(arr):
        nd = arr.ndim
        return pl.BlockSpec(arr.shape, lambda i, _nd=nd: (0,) * _nd)

    data_spec = pl.BlockSpec((batch_block, S, E), lambda i: (i, 0, 0))
    out_spec = pl.BlockSpec((2, batch_block * S, E), lambda i: (0, i, 0))

    kernel = functools.partial(_crosstalk_kernel, num_heads=num_heads)
    out = pl.pallas_call(
        kernel,
        out_shape=jax.ShapeDtypeStruct((2, B * S, E), jnp.float32),
        grid=grid,
        in_specs=[data_spec, data_spec] + [full_spec(a) for a in params],
        out_specs=out_spec,
        scratch_shapes=[pltpu.VMEM((batch_block * 2 * S, E), jnp.float32)],
        compiler_params=pltpu.CompilerParams(
            dimension_semantics=("parallel",)),
    )(eig, feat, *params)

    out_eig = out[0].reshape(B, S, E)
    out_feat = out[1].reshape(B, S, E)
    return out_eig, out_feat


# ----------------------------------------------------------------------------
# Deterministic "raw" parameter init (weights already stored as (in, out)),
# mirroring the PyTorch module's parameters, plus a packing step that fuses
# QKV / dense1|dense2 and folds the attention scale for the kernel.
# ----------------------------------------------------------------------------
def init_raw_params(key, E):
    ks = jax.random.split(key, 17)

    def w(k, shape, scale=0.05):
        return (scale * jax.random.normal(k, shape)).astype(jnp.float32)

    p = {}
    # rows: [eig_mha_norm, feat_mha_norm, eig_ffn.norm, feat_ffn.norm]
    p['ln_g'] = (1.0 + 0.1 * jax.random.normal(ks[0], (4, E))).astype(jnp.float32)
    p['ln_b'] = w(ks[1], (4, E), 0.1)
    # MHA in_proj split into q/k/v (transposed to (E, E)), biases stacked (3, E)
    p['q_w'] = w(ks[2], (E, E))
    p['k_w'] = w(ks[3], (E, E))
    p['v_w'] = w(ks[4], (E, E))
    p['qkv_b'] = w(ks[5], (3, E), 0.02)
    p['out_w'] = w(ks[6], (E, E))
    p['out_b'] = w(ks[7], (1, E), 0.02)
    # dense1 / dense2 : (E, E//2), biases stacked (2, E//2)
    p['d1_w'] = w(ks[8], (E, E // 2))
    p['d2_w'] = w(ks[9], (E, E // 2))
    p['d12_b'] = w(ks[10], (2, E // 2), 0.02)
    # ResidualFeedForward FFNs
    p['eig_ffn_w1'] = w(ks[11], (E, E))
    p['eig_ffn_w2'] = w(ks[12], (E, E))
    p['eig_ffn_b'] = w(ks[13], (2, E), 0.02)
    p['feat_ffn_w1'] = w(ks[14], (E, E))
    p['feat_ffn_w2'] = w(ks[15], (E, E))
    p['feat_ffn_b'] = w(ks[16], (2, E), 0.02)
    return p


def pack_params(raw, E, num_heads):
    """Fuse QKV and dense1/dense2 and fold 1/sqrt(Dh) into the q projection."""
    Dh = E // num_heads
    scale = jnp.float32(1.0 / math.sqrt(Dh))
    p = {}
    p['ln_g'] = raw['ln_g']
    p['ln_b'] = raw['ln_b']
    p['qkv_w'] = jnp.concatenate(
        [raw['q_w'] * scale, raw['k_w'], raw['v_w']], axis=1)          # (E, 3E)
    p['qkv_b'] = jnp.concatenate(
        [raw['qkv_b'][0] * scale, raw['qkv_b'][1], raw['qkv_b'][2]])[None, :]  # (1, 3E)
    p['out_w'] = raw['out_w']
    p['out_b'] = raw['out_b']
    p['d_w'] = jnp.concatenate([raw['d1_w'], raw['d2_w']], axis=1)     # (E, E)
    p['d_b'] = jnp.concatenate([raw['d12_b'][0], raw['d12_b'][1]])[None, :]    # (1, E)
    for n in ['eig_ffn_w1', 'eig_ffn_w2', 'eig_ffn_b',
              'feat_ffn_w1', 'feat_ffn_w2', 'feat_ffn_b']:
        p[n] = raw[n]
    return p


# ----------------------------------------------------------------------------
# Pure-JAX reference mirroring the PyTorch forward (uses the raw params).
# ----------------------------------------------------------------------------
def reference_forward(params, eig, feat, num_heads):
    B, S, E = eig.shape
    Dh = E // num_heads

    def ln(x, g, b):
        mu = jnp.mean(x, -1, keepdims=True)
        var = jnp.mean((x - mu) ** 2, -1, keepdims=True)
        return (x - mu) / jnp.sqrt(var + 1e-5) * g + b

    def gelu(x):
        return 0.5 * x * (1.0 + jax.scipy.special.erf(x * 0.7071067811865476))

    eig_n = ln(eig, params['ln_g'][0], params['ln_b'][0])
    feat_n = ln(feat, params['ln_g'][1], params['ln_b'][1])
    h = jnp.concatenate([eig_n, feat_n], axis=1)           # (B, 2S, E)
    L = h.shape[1]

    q = h @ params['q_w'] + params['qkv_b'][0]
    k = h @ params['k_w'] + params['qkv_b'][1]
    v = h @ params['v_w'] + params['qkv_b'][2]
    q = q.reshape(B, L, num_heads, Dh).transpose(0, 2, 1, 3)
    k = k.reshape(B, L, num_heads, Dh).transpose(0, 2, 1, 3)
    v = v.reshape(B, L, num_heads, Dh).transpose(0, 2, 1, 3)
    s = jnp.einsum('bhqd,bhkd->bhqk', q, k) / jnp.sqrt(jnp.float32(Dh))
    p = jax.nn.softmax(s, axis=-1)
    a = jnp.einsum('bhqk,bhkd->bhqd', p, v)
    a = a.transpose(0, 2, 1, 3).reshape(B, L, E)
    a = a @ params['out_w'] + params['out_b'][0]

    o1 = a @ params['d1_w'] + params['d12_b'][0]           # (B, 2S, E//2)
    o2 = a @ params['d2_w'] + params['d12_b'][1]
    mha_eig = o1.reshape(B, S, E)                          # torch reshape_as
    mha_feat = o2.reshape(B, S, E)

    eig2 = eig_n + mha_eig
    feat2 = feat_n + mha_feat

    def rffn(x, g, b, w1, w2, bb):
        xn = ln(x, g, b)
        y = gelu(xn @ w1 + bb[0]) @ w2 + bb[1]
        return x + y

    out_eig = rffn(eig2, params['ln_g'][2], params['ln_b'][2],
                   params['eig_ffn_w1'], params['eig_ffn_w2'], params['eig_ffn_b'])
    out_feat = rffn(feat2, params['ln_g'][3], params['ln_b'][3],
                    params['feat_ffn_w1'], params['feat_ffn_w2'], params['feat_ffn_b'])
    return out_eig, out_feat


# ----------------------------------------------------------------------------
if __name__ == "__main__":
    B, S, E, H = 2, 8, 32, 4       # embed_dim=32, num_atn_heads=4, seq=8
    key = jax.random.PRNGKey(0)
    k_eig, k_feat, k_par = jax.random.split(key, 3)
    eig = jax.random.normal(k_eig, (B, S, E), dtype=jnp.float32)
    feat = jax.random.normal(k_feat, (B, S, E), dtype=jnp.float32)
    raw = init_raw_params(k_par, E)
    packed = pack_params(raw, E, H)

    out_eig, out_feat = crosstalk_transformer(eig, feat, packed, num_heads=H)
    jax.block_until_ready((out_eig, out_feat))

    ref_eig, ref_feat = reference_forward(raw, eig, feat, H)
    assert out_eig.shape == (B, S, E) and out_feat.shape == (B, S, E)
    assert jnp.allclose(out_eig, ref_eig, atol=2e-2, rtol=2e-2)
    assert jnp.allclose(out_feat, ref_feat, atol=2e-2, rtol=2e-2)

    # TODO(synk): key_padding_mask is only supported as None (the module default).
    print("KERNEL_OK")
</pallas_src>

<mosaic_0001>
module attributes {stable_mosaic.version = 11 : i64} {
  func.func @_crosstalk_kernel(%arg0: i32, %arg1: memref<2x8x32xf32, #tpu.memory_space<vmem>>, %arg2: memref<2x8x32xf32, #tpu.memory_space<vmem>>, %arg3: memref<4x32xf32, #tpu.memory_space<vmem>>, %arg4: memref<4x32xf32, #tpu.memory_space<vmem>>, %arg5: memref<32x96xf32, #tpu.memory_space<vmem>>, %arg6: memref<1x96xf32, #tpu.memory_space<vmem>>, %arg7: memref<32x32xf32, #tpu.memory_space<vmem>>, %arg8: memref<1x32xf32, #tpu.memory_space<vmem>>, %arg9: memref<32x32xf32, #tpu.memory_space<vmem>>, %arg10: memref<1x32xf32, #tpu.memory_space<vmem>>, %arg11: memref<32x32xf32, #tpu.memory_space<vmem>>, %arg12: memref<32x32xf32, #tpu.memory_space<vmem>>, %arg13: memref<2x32xf32, #tpu.memory_space<vmem>>, %arg14: memref<32x32xf32, #tpu.memory_space<vmem>>, %arg15: memref<32x32xf32, #tpu.memory_space<vmem>>, %arg16: memref<2x32xf32, #tpu.memory_space<vmem>>, %arg17: memref<2x16x32xf32, #tpu.memory_space<vmem>>, %arg18: memref<32x32xf32, #tpu.memory_space<vmem>>) attributes {dimension_semantics = [#tpu.dimension_semantics<parallel>], iteration_bounds = array<i64: 1>, scalar_prefetch = 0 : i64, scratch_operands = 1 : i64, tpu.core_type = #tpu.core_type<tc>, window_params = [{transform_indices = @transform_0, window_bounds = array<i64: 2, 8, 32>}, {transform_indices = @transform_1, window_bounds = array<i64: 2, 8, 32>}, {pipeline_mode = #tpu.pipeline_mode<synchronous>, transform_indices = @transform_2, window_bounds = array<i64: 4, 32>}, {pipeline_mode = #tpu.pipeline_mode<synchronous>, transform_indices = @transform_3, window_bounds = array<i64: 4, 32>}, {pipeline_mode = #tpu.pipeline_mode<synchronous>, transform_indices = @transform_4, window_bounds = array<i64: 32, 96>}, {pipeline_mode = #tpu.pipeline_mode<synchronous>, transform_indices = @transform_5, window_bounds = array<i64: 1, 96>}, {pipeline_mode = #tpu.pipeline_mode<synchronous>, transform_indices = @transform_6, window_bounds = array<i64: 32, 32>}, {pipeline_mode = #tpu.pipeline_mode<synchronous>, transform_indices = @transform_7, window_bounds = array<i64: 1, 32>}, {pipeline_mode = #tpu.pipeline_mode<synchronous>, transform_indices = @transform_8, window_bounds = array<i64: 32, 32>}, {pipeline_mode = #tpu.pipeline_mode<synchronous>, transform_indices = @transform_9, window_bounds = array<i64: 1, 32>}, {pipeline_mode = #tpu.pipeline_mode<synchronous>, transform_indices = @transform_10, window_bounds = array<i64: 32, 32>}, {pipeline_mode = #tpu.pipeline_mode<synchronous>, transform_indices = @transform_11, window_bounds = array<i64: 32, 32>}, {pipeline_mode = #tpu.pipeline_mode<synchronous>, transform_indices = @transform_12, window_bounds = array<i64: 2, 32>}, {pipeline_mode = #tpu.pipeline_mode<synchronous>, transform_indices = @transform_13, window_bounds = array<i64: 32, 32>}, {pipeline_mode = #tpu.pipeline_mode<synchronous>, transform_indices = @transform_14, window_bounds = array<i64: 32, 32>}, {pipeline_mode = #tpu.pipeline_mode<synchronous>, transform_indices = @transform_15, window_bounds = array<i64: 2, 32>}, {transform_indices = @transform_16, window_bounds = array<i64: 2, 16, 32>}]} {
    %c0 = arith.constant 0 : index
    %c0_0 = arith.constant 0 : index
    %0 = vector.load %arg3[%c0, %c0_0] : memref<4x32xf32, #tpu.memory_space<vmem>>, vector<4x32xf32>
    %c0_1 = arith.constant 0 : index
    %c0_2 = arith.constant 0 : index
    %1 = vector.load %arg4[%c0_1, %c0_2] : memref<4x32xf32, #tpu.memory_space<vmem>>, vector<4x32xf32>
    %c0_3 = arith.constant 0 : index
    %c0_4 = arith.constant 0 : index
    %c0_5 = arith.constant 0 : index
    %2 = vector.load %arg1[%c0_3, %c0_4, %c0_5] : memref<2x8x32xf32, #tpu.memory_space<vmem>>, vector<2x8x32xf32>
    %c0_6 = arith.constant 0 : index
    %c0_7 = arith.constant 0 : index
    %c0_8 = arith.constant 0 : index
    %3 = vector.load %arg2[%c0_6, %c0_7, %c0_8] : memref<2x8x32xf32, #tpu.memory_space<vmem>>, vector<2x8x32xf32>
    %4 = vector.extract_strided_slice %0 {offsets = [0, 0], sizes = [1, 32], strides = [1, 1]} : vector<4x32xf32> to vector<1x32xf32>
    %5 = vector.extract_strided_slice %1 {offsets = [0, 0], sizes = [1, 32], strides = [1, 1]} : vector<4x32xf32> to vector<1x32xf32>
    %cst = arith.constant dense<0.000000e+00> : vector<2x8xf32>
    %6 = vector.multi_reduction <add>, %2, %cst [2] : vector<2x8x32xf32> to vector<2x8xf32>
    %7 = vector.shape_cast %6 : vector<2x8xf32> to vector<2x8x1xf32>
    %cst_9 = arith.constant 3.200000e+01 : f32
    %8 = vector.broadcast %cst_9 : f32 to vector<2x8x1xf32>
    %9 = arith.divf %7, %8 : vector<2x8x1xf32>
    %10 = vector.broadcast %9 : vector<2x8x1xf32> to vector<2x8x32xf32>
    %11 = arith.subf %2, %10 : vector<2x8x32xf32>
    %12 = arith.mulf %11, %11 : vector<2x8x32xf32>
    %cst_10 = arith.constant dense<0.000000e+00> : vector<2x8xf32>
    %13 = vector.multi_reduction <add>, %12, %cst_10 [2] : vector<2x8x32xf32> to vector<2x8xf32>
    %14 = vector.shape_cast %13 : vector<2x8xf32> to vector<2x8x1xf32>
    %cst_11 = arith.constant 3.200000e+01 : f32
    %15 = vector.broadcast %cst_11 : f32 to vector<2x8x1xf32>
    %16 = arith.divf %14, %15 : vector<2x8x1xf32>
    %17 = vector.broadcast %9 : vector<2x8x1xf32> to vector<2x8x32xf32>
    %18 = arith.subf %2, %17 : vector<2x8x32xf32>
    %cst_12 = arith.constant 9.99999974E-6 : f32
    %19 = vector.broadcast %cst_12 : f32 to vector<2x8x1xf32>
    %20 = arith.addf %16, %19 : vector<2x8x1xf32>
    %21 = math.rsqrt %20 : vector<2x8x1xf32>
    %22 = vector.broadcast %21 : vector<2x8x1xf32> to vector<2x8x32xf32>
    %23 = arith.mulf %18, %22 : vector<2x8x32xf32>
    %24 = vector.shape_cast %4 : vector<1x32xf32> to vector<1x1x32xf32>
    %25 = vector.broadcast %24 : vector<1x1x32xf32> to vector<2x8x32xf32>
    %26 = arith.mulf %23, %25 : vector<2x8x32xf32>
    %27 = vector.shape_cast %5 : vector<1x32xf32> to vector<1x1x32xf32>
    %28 = vector.broadcast %27 : vector<1x1x32xf32> to vector<2x8x32xf32>
    %29 = arith.addf %26, %28 : vector<2x8x32xf32>
    %30 = vector.extract_strided_slice %0 {offsets = [1, 0], sizes = [1, 32], strides = [1, 1]} : vector<4x32xf32> to vector<1x32xf32>
    %31 = vector.extract_strided_slice %1 {offsets = [1, 0], sizes = [1, 32], strides = [1, 1]} : vector<4x32xf32> to vector<1x32xf32>
    %cst_13 = arith.constant dense<0.000000e+00> : vector<2x8xf32>
    %32 = vector.multi_reduction <add>, %3, %cst_13 [2] : vector<2x8x32xf32> to vector<2x8xf32>
    %33 = vector.shape_cast %32 : vector<2x8xf32> to vector<2x8x1xf32>
    %cst_14 = arith.constant 3.200000e+01 : f32
    %34 = vector.broadcast %cst_14 : f32 to vector<2x8x1xf32>
    %35 = arith.divf %33, %34 : vector<2x8x1xf32>
    %36 = vector.broadcast %35 : vector<2x8x1xf32> to vector<2x8x32xf32>
    %37 = arith.subf %3, %36 : vector<2x8x32xf32>
    %38 = arith.mulf %37, %37 : vector<2x8x32xf32>
    %cst_15 = arith.constant dense<0.000000e+00> : vector<2x8xf32>
    %39 = vector.multi_reduction <add>, %38, %cst_15 [2] : vector<2x8x32xf32> to vector<2x8xf32>
    %40 = vector.shape_cast %39 : vector<2x8xf32> to vector<2x8x1xf32>
    %cst_16 = arith.constant 3.200000e+01 : f32
    %41 = vector.broadcast %cst_16 : f32 to vector<2x8x1xf32>
    %42 = arith.divf %40, %41 : vector<2x8x1xf32>
    %43 = vector.broadcast %35 : vector<2x8x1xf32> to vector<2x8x32xf32>
    %44 = arith.subf %3, %43 : vector<2x8x32xf32>
    %cst_17 = arith.constant 9.99999974E-6 : f32
    %45 = vector.broadcast %cst_17 : f32 to vector<2x8x1xf32>
    %46 = arith.addf %42, %45 : vector<2x8x1xf32>
    %47 = math.rsqrt %46 : vector<2x8x1xf32>
    %48 = vector.broadcast %47 : vector<2x8x1xf32> to vector<2x8x32xf32>
    %49 = arith.mulf %44, %48 : vector<2x8x32xf32>
    %50 = vector.shape_cast %30 : vector<1x32xf32> to vector<1x1x32xf32>
    %51 = vector.broadcast %50 : vector<1x1x32xf32> to vector<2x8x32xf32>
    %52 = arith.mulf %49, %51 : vector<2x8x32xf32>
    %53 = vector.shape_cast %31 : vector<1x32xf32> to vector<1x1x32xf32>
    %54 = vector.broadcast %53 : vector<1x1x32xf32> to vector<2x8x32xf32>
    %55 = arith.addf %52, %54 : vector<2x8x32xf32>
    %56 = tpu.concatenate %29, %55 in 1 : vector<2x8x32xf32>, vector<2x8x32xf32> -> vector<2x16x32xf32>
    %57 = vector.shape_cast %56 : vector<2x16x32xf32> to vector<32x32xf32>
    %c0_18 = arith.constant 0 : index
    %c0_19 = arith.constant 0 : index
    %58 = vector.load %arg5[%c0_18, %c0_19] : memref<32x96xf32, #tpu.memory_space<vmem>>, vector<32x96xf32>
    %cst_20 = arith.constant dense<0.000000e+00> : vector<32x96xf32>
    %59 = tpu.matmul %57, %58, %cst_20 {dimension_numbers = #tpu.dot_dimension_numbers<[1], [0], [0], [1], [0, 0, 1, 1], [], []>} : vector<32x32xf32>, vector<32x96xf32>, vector<32x96xf32> -> vector<32x96xf32>
    %c0_21 = arith.constant 0 : index
    %c0_22 = arith.constant 0 : index
    %60 = vector.load %arg6[%c0_21, %c0_22] : memref<1x96xf32, #tpu.memory_space<vmem>>, vector<1x96xf32>
    %61 = vector.broadcast %60 : vector<1x96xf32> to vector<32x96xf32>
    %62 = arith.addf %59, %61 : vector<32x96xf32>
    %63 = vector.shape_cast %62 : vector<32x96xf32> to vector<2x16x96xf32>
    %64 = vector.extract_strided_slice %63 {offsets = [0, 0, 0], sizes = [2, 16, 8], strides = [1, 1, 1]} : vector<2x16x96xf32> to vector<2x16x8xf32>
    %65 = vector.extract_strided_slice %63 {offsets = [0, 0, 8], sizes = [2, 16, 8], strides = [1, 1, 1]} : vector<2x16x96xf32> to vector<2x16x8xf32>
    %66 = vector.extract_strided_slice %63 {offsets = [0, 0, 16], sizes = [2, 16, 8], strides = [1, 1, 1]} : vector<2x16x96xf32> to vector<2x16x8xf32>
    %67 = vector.extract_strided_slice %63 {offsets = [0, 0, 24], sizes = [2, 16, 8], strides = [1, 1, 1]} : vector<2x16x96xf32> to vector<2x16x8xf32>
    %68 = tpu.concatenate %64, %65, %66, %67 in 0 : vector<2x16x8xf32>, vector<2x16x8xf32>, vector<2x16x8xf32>, vector<2x16x8xf32> -> vector<8x16x8xf32>
    %69 = vector.extract_strided_slice %63 {offsets = [0, 0, 32], sizes = [2, 16, 8], strides = [1, 1, 1]} : vector<2x16x96xf32> to vector<2x16x8xf32>
    %70 = vector.extract_strided_slice %63 {offsets = [0, 0, 40], sizes = [2, 16, 8], strides = [1, 1, 1]} : vector<2x16x96xf32> to vector<2x16x8xf32>
    %71 = vector.extract_strided_slice %63 {offsets = [0, 0, 48], sizes = [2, 16, 8], strides = [1, 1, 1]} : vector<2x16x96xf32> to vector<2x16x8xf32>
    %72 = vector.extract_strided_slice %63 {offsets = [0, 0, 56], sizes = [2, 16, 8], strides = [1, 1, 1]} : vector<2x16x96xf32> to vector<2x16x8xf32>
    %73 = tpu.concatenate %69, %70, %71, %72 in 0 : vector<2x16x8xf32>, vector<2x16x8xf32>, vector<2x16x8xf32>, vector<2x16x8xf32> -> vector<8x16x8xf32>
    %74 = vector.extract_strided_slice %63 {offsets = [0, 0, 64], sizes = [2, 16, 8], strides = [1, 1, 1]} : vector<2x16x96xf32> to vector<2x16x8xf32>
    %75 = vector.extract_strided_slice %63 {offsets = [0, 0, 72], sizes = [2, 16, 8], strides = [1, 1, 1]} : vector<2x16x96xf32> to vector<2x16x8xf32>
    %76 = vector.extract_strided_slice %63 {offsets = [0, 0, 80], sizes = [2, 16, 8], strides = [1, 1, 1]} : vector<2x16x96xf32> to vector<2x16x8xf32>
    %77 = vector.extract_strided_slice %63 {offsets = [0, 0, 88], sizes = [2, 16, 8], strides = [1, 1, 1]} : vector<2x16x96xf32> to vector<2x16x8xf32>
    %78 = tpu.concatenate %74, %75, %76, %77 in 0 : vector<2x16x8xf32>, vector<2x16x8xf32>, vector<2x16x8xf32>, vector<2x16x8xf32> -> vector<8x16x8xf32>
    %cst_23 = arith.constant dense<0.000000e+00> : vector<8x16x16xf32>
    %79 = tpu.matmul %68, %73, %cst_23 {dimension_numbers = #tpu.dot_dimension_numbers<[2], [2], [1], [1], [0, 0, 0, 1, 1, 1], [0], [0]>} : vector<8x16x8xf32>, vector<8x16x8xf32>, vector<8x16x16xf32> -> vector<8x16x16xf32>
    %cst_24 = arith.constant dense<0xFF800000> : vector<8x16xf32>
    %80 = vector.multi_reduction <maximumf>, %79, %cst_24 [2] : vector<8x16x16xf32> to vector<8x16xf32>
    %81 = vector.shape_cast %80 : vector<8x16xf32> to vector<8x16x1xf32>
    %82 = vector.broadcast %81 : vector<8x16x1xf32> to vector<8x16x16xf32>
    %83 = arith.subf %79, %82 : vector<8x16x16xf32>
    %84 = math.exp %83 : vector<8x16x16xf32>
    %cst_25 = arith.constant dense<0.000000e+00> : vector<8x16xf32>
    %85 = vector.multi_reduction <add>, %84, %cst_25 [2] : vector<8x16x16xf32> to vector<8x16xf32>
    %86 = vector.shape_cast %85 : vector<8x16xf32> to vector<8x16x1xf32>
    %87 = tpu.reciprocal %86 {approx = true} : vector<8x16x1xf32> -> vector<8x16x1xf32>
    %88 = vector.broadcast %87 : vector<8x16x1xf32> to vector<8x16x16xf32>
    %89 = arith.mulf %84, %88 : vector<8x16x16xf32>
    %cst_26 = arith.constant dense<0.000000e+00> : vector<8x16x8xf32>
    %90 = tpu.matmul %89, %78, %cst_26 {dimension_numbers = #tpu.dot_dimension_numbers<[2], [1], [1], [2], [0, 0, 0, 1, 1, 2], [0], [0]>} : vector<8x16x16xf32>, vector<8x16x8xf32>, vector<8x16x8xf32> -> vector<8x16x8xf32>
    %91 = vector.extract_strided_slice %90 {offsets = [0, 0, 0], sizes = [2, 16, 8], strides = [1, 1, 1]} : vector<8x16x8xf32> to vector<2x16x8xf32>
    %92 = vector.extract_strided_slice %90 {offsets = [2, 0, 0], sizes = [2, 16, 8], strides = [1, 1, 1]} : vector<8x16x8xf32> to vector<2x16x8xf32>
    %93 = vector.extract_strided_slice %90 {offsets = [4, 0, 0], sizes = [2, 16, 8], strides = [1, 1, 1]} : vector<8x16x8xf32> to vector<2x16x8xf32>
    %94 = vector.extract_strided_slice %90 {offsets = [6, 0, 0], sizes = [2, 16, 8], strides = [1, 1, 1]} : vector<8x16x8xf32> to vector<2x16x8xf32>
    %95 = tpu.concatenate %91, %92, %93, %94 in 2 : vector<2x16x8xf32>, vector<2x16x8xf32>, vector<2x16x8xf32>, vector<2x16x8xf32> -> vector<2x16x32xf32>
    %96 = vector.shape_cast %95 : vector<2x16x32xf32> to vector<32x32xf32>
    %c0_27 = arith.constant 0 : index
    %c0_28 = arith.constant 0 : index
    %97 = vector.load %arg7[%c0_27, %c0_28] : memref<32x32xf32, #tpu.memory_space<vmem>>, vector<32x32xf32>
    %cst_29 = arith.constant dense<0.000000e+00> : vector<32x32xf32>
    %98 = tpu.matmul %96, %97, %cst_29 {dimension_numbers = #tpu.dot_dimension_numbers<[1], [0], [0], [1], [0, 0, 1, 1], [], []>} : vector<32x32xf32>, vector<32x32xf32>, vector<32x32xf32> -> vector<32x32xf32>
    %c0_30 = arith.constant 0 : index
    %c0_31 = arith.constant 0 : index
    %99 = vector.load %arg8[%c0_30, %c0_31] : memref<1x32xf32, #tpu.memory_space<vmem>>, vector<1x32xf32>
    %100 = vector.broadcast %99 : vector<1x32xf32> to vector<32x32xf32>
    %101 = arith.addf %98, %100 : vector<32x32xf32>
    %c0_32 = arith.constant 0 : index
    %c0_33 = arith.constant 0 : index
    %102 = vector.load %arg9[%c0_32, %c0_33] : memref<32x32xf32, #tpu.memory_space<vmem>>, vector<32x32xf32>
    %cst_34 = arith.constant dense<0.000000e+00> : vector<32x32xf32>
    %103 = tpu.matmul %101, %102, %cst_34 {dimension_numbers = #tpu.dot_dimension_numbers<[1], [0], [0], [1], [0, 0, 1, 1], [], []>} : vector<32x32xf32>, vector<32x32xf32>, vector<32x32xf32> -> vector<32x32xf32>
    %c0_35 = arith.constant 0 : index
    %c0_36 = arith.constant 0 : index
    %104 = vector.load %arg10[%c0_35, %c0_36] : memref<1x32xf32, #tpu.memory_space<vmem>>, vector<1x32xf32>
    %105 = vector.broadcast %104 : vector<1x32xf32> to vector<32x32xf32>
    %106 = arith.addf %103, %105 : vector<32x32xf32>
    %c0_37 = arith.constant 0 : index
    %c0_38 = arith.constant 0 : index
    %107 = vector.load %arg18[%c0_37, %c0_38] : memref<32x32xf32, #tpu.memory_space<vmem>>, vector<32x32xf32>
    tpu.vector_store %arg18[%c0_37, %c0_38], %106 {strides = array<i32>} : memref<32x32xf32, #tpu.memory_space<vmem>>, vector<32x32xf32>,
    %c0_39 = arith.constant 0 : index
    %c0_40 = arith.constant 0 : index
    %108 = tpu.strided_load %arg18[%c0_39, %c0_40] {strides = array<i32: 2, 1>} : memref<32x32xf32, #tpu.memory_space<vmem>>, vector<16x32xf32>
    %c1 = arith.constant 1 : index
    %c0_41 = arith.constant 0 : index
    %109 = tpu.strided_load %arg18[%c1, %c0_41] {strides = array<i32: 2, 1>} : memref<32x32xf32, #tpu.memory_space<vmem>>, vector<16x32xf32>
    %110 = vector.extract_strided_slice %108 {offsets = [0, 0], sizes = [16, 16], strides = [1, 1]} : vector<16x32xf32> to vector<16x16xf32>
    %111 = vector.extract_strided_slice %109 {offsets = [0, 0], sizes = [16, 16], strides = [1, 1]} : vector<16x32xf32> to vector<16x16xf32>
    %112 = tpu.concatenate %110, %111 in 1 : vector<16x16xf32>, vector<16x16xf32> -> vector<16x32xf32>
    %113 = vector.extract_strided_slice %108 {offsets = [0, 16], sizes = [16, 16], strides = [1, 1]} : vector<16x32xf32> to vector<16x16xf32>
    %114 = vector.extract_strided_slice %109 {offsets = [0, 16], sizes = [16, 16], strides = [1, 1]} : vector<16x32xf32> to vector<16x16xf32>
    %115 = tpu.concatenate %113, %114 in 1 : vector<16x16xf32>, vector<16x16xf32> -> vector<16x32xf32>
    %116 = vector.shape_cast %29 : vector<2x8x32xf32> to vector<16x32xf32>
    %117 = arith.addf %116, %112 : vector<16x32xf32>
    %118 = vector.shape_cast %55 : vector<2x8x32xf32> to vector<16x32xf32>
    %119 = arith.addf %118, %115 : vector<16x32xf32>
    %120 = vector.extract_strided_slice %0 {offsets = [2, 0], sizes = [1, 32], strides = [1, 1]} : vector<4x32xf32> to vector<1x32xf32>
    %121 = vector.extract_strided_slice %1 {offsets = [2, 0], sizes = [1, 32], strides = [1, 1]} : vector<4x32xf32> to vector<1x32xf32>
    %c0_42 = arith.constant 0 : index
    %c0_43 = arith.constant 0 : index
    %122 = vector.load %arg11[%c0_42, %c0_43] : memref<32x32xf32, #tpu.memory_space<vmem>>, vector<32x32xf32>
    %c0_44 = arith.constant 0 : index
    %c0_45 = arith.constant 0 : index
    %123 = vector.load %arg12[%c0_44, %c0_45] : memref<32x32xf32, #tpu.memory_space<vmem>>, vector<32x32xf32>
    %c0_46 = arith.constant 0 : index
    %c0_47 = arith.constant 0 : index
    %124 = vector.load %arg13[%c0_46, %c0_47] : memref<2x32xf32, #tpu.memory_space<vmem>>, vector<2x32xf32>
    %cst_48 = arith.constant dense<0.000000e+00> : vector<16xf32>
    %125 = vector.multi_reduction <add>, %117, %cst_48 [1] : vector<16x32xf32> to vector<16xf32>
    %126 = vector.shape_cast %125 : vector<16xf32> to vector<16x1xf32>
    %cst_49 = arith.constant 3.200000e+01 : f32
    %127 = vector.broadcast %cst_49 : f32 to vector<16x1xf32>
    %128 = arith.divf %126, %127 : vector<16x1xf32>
    %129 = vector.broadcast %128 : vector<16x1xf32> to vector<16x32xf32>
    %130 = arith.subf %117, %129 : vector<16x32xf32>
    %131 = arith.mulf %130, %130 : vector<16x32xf32>
    %cst_50 = arith.constant dense<0.000000e+00> : vector<16xf32>
    %132 = vector.multi_reduction <add>, %131, %cst_50 [1] : vector<16x32xf32> to vector<16xf32>
    %133 = vector.shape_cast %132 : vector<16xf32> to vector<16x1xf32>
    %cst_51 = arith.constant 3.200000e+01 : f32
    %134 = vector.broadcast %cst_51 : f32 to vector<16x1xf32>
    %135 = arith.divf %133, %134 : vector<16x1xf32>
    %136 = vector.broadcast %128 : vector<16x1xf32> to vector<16x32xf32>
    %137 = arith.subf %117, %136 : vector<16x32xf32>
    %cst_52 = arith.constant 9.99999974E-6 : f32
    %138 = vector.broadcast %cst_52 : f32 to vector<16x1xf32>
    %139 = arith.addf %135, %138 : vector<16x1xf32>
    %140 = math.rsqrt %139 : vector<16x1xf32>
    %141 = vector.broadcast %140 : vector<16x1xf32> to vector<16x32xf32>
    %142 = arith.mulf %137, %141 : vector<16x32xf32>
    %143 = vector.broadcast %120 : vector<1x32xf32> to vector<16x32xf32>
    %144 = arith.mulf %142, %143 : vector<16x32xf32>
    %145 = vector.broadcast %121 : vector<1x32xf32> to vector<16x32xf32>
    %146 = arith.addf %144, %145 : vector<16x32xf32>
    %cst_53 = arith.constant dense<0.000000e+00> : vector<16x32xf32>
    %147 = tpu.matmul %146, %122, %cst_53 {dimension_numbers = #tpu.dot_dimension_numbers<[1], [0], [0], [1], [0, 0, 1, 1], [], []>} : vector<16x32xf32>, vector<32x32xf32>, vector<16x32xf32> -> vector<16x32xf32>
    %148 = vector.extract_strided_slice %124 {offsets = [0, 0], sizes = [1, 32], strides = [1, 1]} : vector<2x32xf32> to vector<1x32xf32>
    %149 = vector.broadcast %148 : vector<1x32xf32> to vector<16x32xf32>
    %150 = arith.addf %147, %149 : vector<16x32xf32>
    %cst_54 = arith.constant 5.000000e-01 : f32
    %151 = vector.broadcast %cst_54 : f32 to vector<16x32xf32>
    %152 = arith.mulf %151, %150 : vector<16x32xf32>
    %cst_55 = arith.constant 0.707106769 : f32
    %153 = vector.broadcast %cst_55 : f32 to vector<16x32xf32>
    %154 = arith.mulf %150, %153 : vector<16x32xf32>
    %155 = math.erf %154 : vector<16x32xf32>
    %cst_56 = arith.constant 1.000000e+00 : f32
    %156 = vector.broadcast %cst_56 : f32 to vector<16x32xf32>
    %157 = arith.addf %156, %155 : vector<16x32xf32>
    %158 = arith.mulf %152, %157 : vector<16x32xf32>
    %cst_57 = arith.constant dense<0.000000e+00> : vector<16x32xf32>
    %159 = tpu.matmul %158, %123, %cst_57 {dimension_numbers = #tpu.dot_dimension_numbers<[1], [0], [0], [1], [0, 0, 1, 1], [], []>} : vector<16x32xf32>, vector<32x32xf32>, vector<16x32xf32> -> vector<16x32xf32>
    %160 = vector.extract_strided_slice %124 {offsets = [1, 0], sizes = [1, 32], strides = [1, 1]} : vector<2x32xf32> to vector<1x32xf32>
    %161 = vector.broadcast %160 : vector<1x32xf32> to vector<16x32xf32>
    %162 = arith.addf %159, %161 : vector<16x32xf32>
    %163 = arith.addf %117, %162 : vector<16x32xf32>
    %c0_58 = arith.constant 0 : index
    %c0_59 = arith.constant 0 : index
    %c0_60 = arith.constant 0 : index
    %164 = vector.load %arg17[%c0_58, %c0_59, %c0_60] : memref<2x16x32xf32, #tpu.memory_space<vmem>>, vector<1x16x32xf32>
    %165 = vector.shape_cast %164 : vector<1x16x32xf32> to vector<16x32xf32>
    %166 = vector.shape_cast %163 : vector<16x32xf32> to vector<1x16x32xf32>
    tpu.vector_store %arg17[%c0_58, %c0_59, %c0_60], %166 {strides = array<i32>} : memref<2x16x32xf32, #tpu.memory_space<vmem>>, vector<1x16x32xf32>,
    %167 = vector.extract_strided_slice %0 {offsets = [3, 0], sizes = [1, 32], strides = [1, 1]} : vector<4x32xf32> to vector<1x32xf32>
    %168 = vector.extract_strided_slice %1 {offsets = [3, 0], sizes = [1, 32], strides = [1, 1]} : vector<4x32xf32> to vector<1x32xf32>
    %c0_61 = arith.constant 0 : index
    %c0_62 = arith.constant 0 : index
    %169 = vector.load %arg14[%c0_61, %c0_62] : memref<32x32xf32, #tpu.memory_space<vmem>>, vector<32x32xf32>
    %c0_63 = arith.constant 0 : index
    %c0_64 = arith.constant 0 : index
    %170 = vector.load %arg15[%c0_63, %c0_64] : memref<32x32xf32, #tpu.memory_space<vmem>>, vector<32x32xf32>
    %c0_65 = arith.constant 0 : index
    %c0_66 = arith.constant 0 : index
    %171 = vector.load %arg16[%c0_65, %c0_66] : memref<2x32xf32, #tpu.memory_space<vmem>>, vector<2x32xf32>
    %cst_67 = arith.constant dense<0.000000e+00> : vector<16xf32>
    %172 = vector.multi_reduction <add>, %119, %cst_67 [1] : vector<16x32xf32> to vector<16xf32>
    %173 = vector.shape_cast %172 : vector<16xf32> to vector<16x1xf32>
    %cst_68 = arith.constant 3.200000e+01 : f32
    %174 = vector.broadcast %cst_68 : f32 to vector<16x1xf32>
    %175 = arith.divf %173, %174 : vector<16x1xf32>
    %176 = vector.broadcast %175 : vector<16x1xf32> to vector<16x32xf32>
    %177 = arith.subf %119, %176 : vector<16x32xf32>
    %178 = arith.mulf %177, %177 : vector<16x32xf32>
    %cst_69 = arith.constant dense<0.000000e+00> : vector<16xf32>
    %179 = vector.multi_reduction <add>, %178, %cst_69 [1] : vector<16x32xf32> to vector<16xf32>
    %180 = vector.shape_cast %179 : vector<16xf32> to vector<16x1xf32>
    %cst_70 = arith.constant 3.200000e+01 : f32
    %181 = vector.broadcast %cst_70 : f32 to vector<16x1xf32>
    %182 = arith.divf %180, %181 : vector<16x1xf32>
    %183 = vector.broadcast %175 : vector<16x1xf32> to vector<16x32xf32>
    %184 = arith.subf %119, %183 : vector<16x32xf32>
    %cst_71 = arith.constant 9.99999974E-6 : f32
    %185 = vector.broadcast %cst_71 : f32 to vector<16x1xf32>
    %186 = arith.addf %182, %185 : vector<16x1xf32>
    %187 = math.rsqrt %186 : vector<16x1xf32>
    %188 = vector.broadcast %187 : vector<16x1xf32> to vector<16x32xf32>
    %189 = arith.mulf %184, %188 : vector<16x32xf32>
    %190 = vector.broadcast %167 : vector<1x32xf32> to vector<16x32xf32>
    %191 = arith.mulf %189, %190 : vector<16x32xf32>
    %192 = vector.broadcast %168 : vector<1x32xf32> to vector<16x32xf32>
    %193 = arith.addf %191, %192 : vector<16x32xf32>
    %cst_72 = arith.constant dense<0.000000e+00> : vector<16x32xf32>
    %194 = tpu.matmul %193, %169, %cst_72 {dimension_numbers = #tpu.dot_dimension_numbers<[1], [0], [0], [1], [0, 0, 1, 1], [], []>} : vector<16x32xf32>, vector<32x32xf32>, vector<16x32xf32> -> vector<16x32xf32>
    %195 = vector.extract_strided_slice %171 {offsets = [0, 0], sizes = [1, 32], strides = [1, 1]} : vector<2x32xf32> to vector<1x32xf32>
    %196 = vector.broadcast %195 : vector<1x32xf32> to vector<16x32xf32>
    %197 = arith.addf %194, %196 : vector<16x32xf32>
    %cst_73 = arith.constant 5.000000e-01 : f32
    %198 = vector.broadcast %cst_73 : f32 to vector<16x32xf32>
    %199 = arith.mulf %198, %197 : vector<16x32xf32>
    %cst_74 = arith.constant 0.707106769 : f32
    %200 = vector.broadcast %cst_74 : f32 to vector<16x32xf32>
    %201 = arith.mulf %197, %200 : vector<16x32xf32>
    %202 = math.erf %201 : vector<16x32xf32>
    %cst_75 = arith.constant 1.000000e+00 : f32
    %203 = vector.broadcast %cst_75 : f32 to vector<16x32xf32>
    %204 = arith.addf %203, %202 : vector<16x32xf32>
    %205 = arith.mulf %199, %204 : vector<16x32xf32>
    %cst_76 = arith.constant dense<0.000000e+00> : vector<16x32xf32>
    %206 = tpu.matmul %205, %170, %cst_76 {dimension_numbers = #tpu.dot_dimension_numbers<[1], [0], [0], [1], [0, 0, 1, 1], [], []>} : vector<16x32xf32>, vector<32x32xf32>, vector<16x32xf32> -> vector<16x32xf32>
    %207 = vector.extract_strided_slice %171 {offsets = [1, 0], sizes = [1, 32], strides = [1, 1]} : vector<2x32xf32> to vector<1x32xf32>
    %208 = vector.broadcast %207 : vector<1x32xf32> to vector<16x32xf32>
    %209 = arith.addf %206, %208 : vector<16x32xf32>
    %210 = arith.addf %119, %209 : vector<16x32xf32>
    %c1_77 = arith.constant 1 : index
    %c0_78 = arith.constant 0 : index
    %c0_79 = arith.constant 0 : index
    %211 = vector.load %arg17[%c1_77, %c0_78, %c0_79] : memref<2x16x32xf32, #tpu.memory_space<vmem>>, vector<1x16x32xf32>
    %212 = vector.shape_cast %211 : vector<1x16x32xf32> to vector<16x32xf32>
    %213 = vector.shape_cast %210 : vector<16x32xf32> to vector<1x16x32xf32>
    tpu.vector_store %arg17[%c1_77, %c0_78, %c0_79], %213 {strides = array<i32>} : memref<2x16x32xf32, #tpu.memory_space<vmem>>, vector<1x16x32xf32>,
    return
  }
  func.func @transform_0(%arg0: i32) -> (i32, i32, i32) {
    %c0_i32 = arith.constant 0 : i32
    %c0_i32_0 = arith.constant 0 : i32
    %c0_i32_1 = arith.constant 0 : i32
    return %arg0, %c0_i32, %c0_i32_0 : i32, i32, i32
  }
  func.func @transform_1(%arg0: i32) -> (i32, i32, i32) {
    %c0_i32 = arith.constant 0 : i32
    %c0_i32_0 = arith.constant 0 : i32
    %c0_i32_1 = arith.constant 0 : i32
    return %arg0, %c0_i32, %c0_i32_0 : i32, i32, i32
  }
  func.func @transform_2(%arg0: i32) -> (i32, i32) {
    %c0_i32 = arith.constant 0 : i32
    %c0_i32_0 = arith.constant 0 : i32
    %c0_i32_1 = arith.constant 0 : i32
    return %c0_i32, %c0_i32_0 : i32, i32
  }
  func.func @transform_3(%arg0: i32) -> (i32, i32) {
    %c0_i32 = arith.constant 0 : i32
    %c0_i32_0 = arith.constant 0 : i32
    %c0_i32_1 = arith.constant 0 : i32
    return %c0_i32, %c0_i32_0 : i32, i32
  }
  func.func @transform_4(%arg0: i32) -> (i32, i32) {
    %c0_i32 = arith.constant 0 : i32
    %c0_i32_0 = arith.constant 0 : i32
    %c0_i32_1 = arith.constant 0 : i32
    return %c0_i32, %c0_i32_0 : i32, i32
  }
  func.func @transform_5(%arg0: i32) -> (i32, i32) {
    %c0_i32 = arith.constant 0 : i32
    %c0_i32_0 = arith.constant 0 : i32
    %c0_i32_1 = arith.constant 0 : i32
    return %c0_i32, %c0_i32_0 : i32, i32
  }
  func.func @transform_6(%arg0: i32) -> (i32, i32) {
    %c0_i32 = arith.constant 0 : i32
    %c0_i32_0 = arith.constant 0 : i32
    %c0_i32_1 = arith.constant 0 : i32
    return %c0_i32, %c0_i32_0 : i32, i32
  }
  func.func @transform_7(%arg0: i32) -> (i32, i32) {
    %c0_i32 = arith.constant 0 : i32
    %c0_i32_0 = arith.constant 0 : i32
    %c0_i32_1 = arith.constant 0 : i32
    return %c0_i32, %c0_i32_0 : i32, i32
  }
  func.func @transform_8(%arg0: i32) -> (i32, i32) {
    %c0_i32 = arith.constant 0 : i32
    %c0_i32_0 = arith.constant 0 : i32
    %c0_i32_1 = arith.constant 0 : i32
    return %c0_i32, %c0_i32_0 : i32, i32
  }
  func.func @transform_9(%arg0: i32) -> (i32, i32) {
    %c0_i32 = arith.constant 0 : i32
    %c0_i32_0 = arith.constant 0 : i32
    %c0_i32_1 = arith.constant 0 : i32
    return %c0_i32, %c0_i32_0 : i32, i32
  }
  func.func @transform_10(%arg0: i32) -> (i32, i32) {
    %c0_i32 = arith.constant 0 : i32
    %c0_i32_0 = arith.constant 0 : i32
    %c0_i32_1 = arith.constant 0 : i32
    return %c0_i32, %c0_i32_0 : i32, i32
  }
  func.func @transform_11(%arg0: i32) -> (i32, i32) {
    %c0_i32 = arith.constant 0 : i32
    %c0_i32_0 = arith.constant 0 : i32
    %c0_i32_1 = arith.constant 0 : i32
    return %c0_i32, %c0_i32_0 : i32, i32
  }
  func.func @transform_12(%arg0: i32) -> (i32, i32) {
    %c0_i32 = arith.constant 0 : i32
    %c0_i32_0 = arith.constant 0 : i32
    %c0_i32_1 = arith.constant 0 : i32
    return %c0_i32, %c0_i32_0 : i32, i32
  }
  func.func @transform_13(%arg0: i32) -> (i32, i32) {
    %c0_i32 = arith.constant 0 : i32
    %c0_i32_0 = arith.constant 0 : i32
    %c0_i32_1 = arith.constant 0 : i32
    return %c0_i32, %c0_i32_0 : i32, i32
  }
  func.func @transform_14(%arg0: i32) -> (i32, i32) {
    %c0_i32 = arith.constant 0 : i32
    %c0_i32_0 = arith.constant 0 : i32
    %c0_i32_1 = arith.constant 0 : i32
    return %c0_i32, %c0_i32_0 : i32, i32
  }
  func.func @transform_15(%arg0: i32) -> (i32, i32) {
    %c0_i32 = arith.constant 0 : i32
    %c0_i32_0 = arith.constant 0 : i32
    %c0_i32_1 = arith.constant 0 : i32
    return %c0_i32, %c0_i32_0 : i32, i32
  }
  func.func @transform_16(%arg0: i32) -> (i32, i32, i32) {
    %c0_i32 = arith.constant 0 : i32
    %c0_i32_0 = arith.constant 0 : i32
    %c0_i32_1 = arith.constant 0 : i32
    return %c0_i32, %arg0, %c0_i32_0 : i32, i32, i32
  }
}

</mosaic_0001>

<bundles_post_ra>
// kernel: tpu_custom_call.1
= control target key start
LH: loop header
LB: loop body
LE: loop exit
PB: predicated region body
PF: predicated region fallthrough
CT: control target
= control target key end

     0   :  { %s3093_s0 = inlined_call_operand.hbm [shape: f32[2,8,32], index: 0, kind: input, shape index: {}]   ;;  %s3094_s1 = inlined_call_operand.hbm [shape: f32[2,8,32], index: 1, kind: input, shape index: {}]   ;;  %s3095_s2 = inlined_call_operand.hbm [shape: f32[4,32], index: 2, kind: input, shape index: {}]   ;;  %s3096_s3 = inlined_call_operand.hbm [shape: f32[4,32], index: 3, kind: input, shape index: {}]   ;;  %s3097_s4 = inlined_call_operand.hbm [shape: f32[32,96], index: 4, kind: input, shape index: {}]   ;;  %s3098_s5 = inlined_call_operand.hbm [shape: f32[1,96], index: 5, kind: input, shape index: {}]   ;;  %s3099_s6 = inlined_call_operand.hbm [shape: f32[32,32], index: 6, kind: input, shape index: {}]   ;;  %s3100_s7 = inlined_call_operand.vmem [shape: f32[1,32], index: 7, kind: input, shape index: {}]   ;;  %s3101_s8 = inlined_call_operand.hbm [shape: f32[32,32], index: 8, kind: input, shape index: {}]   ;;  %s3102_s9 = inlined_call_operand.vmem [shape: f32[1,32], index: 9, kind: input, shape index: {}]   ;;  %s3103_s10 = inlined_call_operand.hbm [shape: f32[32,32], index: 10, kind: input, shape index: {}]   ;;  %s3104_s11 = inlined_call_operand.hbm [shape: f32[32,32], index: 11, kind: input, shape index: {}]   ;;  %s3105_s12 = inlined_call_operand.vmem [shape: f32[2,32], index: 12, kind: input, shape index: {}]   ;;  %s3106_s13 = inlined_call_operand.hbm [shape: f32[32,32], index: 13, kind: input, shape index: {}]   ;;  %s3107_s14 = inlined_call_operand.hbm [shape: f32[32,32], index: 14, kind: input, shape index: {}]   ;;  %s3108_s15 = inlined_call_operand.vmem [shape: f32[2,32], index: 15, kind: input, shape index: {}]   ;;  %s3109_s16 = inlined_call_operand.hbm [shape: f32[2,16,32], index: 16, kind: output, shape index: {}]  }
   0x1   :  { %3110 = sst [smem:[#allocation32_spill]] %s3093_s0 }
   0x2   :  { %21 = vsyncpa [#allocation4], 0 }
   0x3   :  { %22 = vsyncpa [#allocation7], 0 }
   0x4   :  { %23 = vsyncpa [#allocation10], 0 }
   0x5   :  { %24 = vsyncpa [#allocation13], 0 }
   0x6   :  { %25 = vsyncpa [#allocation16], 0 }
   0x7   :  { %26 = vsyncpa [#allocation19], 0 }
   0x8   :  { %27 = vsyncpa [#allocation22], 0 }
   0x9   :  { %28 = vsyncpa [#allocation5], 0  ;;  %s46_s23 = sshll.u32 %s3094_s1, 4  ;;  %s2370_s24 = smov [#allocation6]   ;;  %s47_s23 = int_to_ptr.hbm [resolvable:$true] %s46_s23 }
   0xa   :  { %s48_s25 = sshll.u32 %s2370_s24, 4  ;;  %s71_s28 = sshll.u32 %s3096_s3, 4  ;;  %s49_s25 = int_to_ptr.vmem [resolvable:$true] %s48_s25  ;;  %s72_s28 = int_to_ptr.hbm [resolvable:$true] %s71_s28 }
   0xb   :  { %s2371_s29 = smov 128   ;;  %s2372_s30 = smov 8  }
   0xc   :  { %54 = dma.hbm_to_vmem [thread:$0]  %s47_s23, 256, %s49_s25, [#allocation7], %s2371_s29, %s2371_s29, %s2372_s30  }
   0xd   :  { %s2373_s0 = smov [#allocation9]   ;;  %s95_s1 = sshll.u32 %s3098_s5, 4  ;;  %s96_s1 = int_to_ptr.hbm [resolvable:$true] %s95_s1 }
   0xe   :  { %s73_s17 = sshll.u32 %s2373_s0, 4  ;;  %s120_s3 = sshll.u32 %s3101_s8, 4  ;;  %s74_s17 = int_to_ptr.vmem [resolvable:$true] %s73_s17  ;;  %s121_s3 = int_to_ptr.hbm [resolvable:$true] %s120_s3 }
   0xf   :  { %76 = dma.hbm_to_vmem [thread:$0]  %s72_s28, 64, %s74_s17, [#allocation10]  }
  0x10   :  { %s2374_s22 = smov [#allocation12]   ;;  %s2375_s23 = smov [#allocation15]  }
  0x11   :  { %s97_s24 = sshll.u32 %s2374_s22, 4  ;;  %s122_s25 = sshll.u32 %s2375_s23, 4  ;;  %s98_s24 = int_to_ptr.vmem [resolvable:$true] %s97_s24  ;;  %s123_s25 = int_to_ptr.vmem [resolvable:$true] %s122_s25 }
  0x12   :  { %100 = dma.hbm_to_vmem [thread:$0]  %s96_s1, 16, %s98_s24, [#allocation13]  }
  0x13   :  { %s148_s0 = sshll.u32 %s3104_s11, 4  ;;  %s3111_s8 = sld [smem:[#allocation32_spill]]  ;;  %s149_s0 = int_to_ptr.hbm [resolvable:$true] %s148_s0 }
  0x14   :  { %128 = dma.hbm_to_vmem [thread:$0]  %s121_s3, 512, %s123_s25, [#allocation16], %s2371_s29, %s2371_s29, %s2372_s30  }
  0x15   :  { %s2376_s18 = smov [#allocation18]   ;;  %s2377_s1 = smov [#allocation3]  }
  0x16   :  { %s150_s19 = sshll.u32 %s2376_s18, 4  ;;  %s35_s11 = sshll.u32 %s2377_s1, 4  ;;  %s151_s19 = int_to_ptr.vmem [resolvable:$true] %s150_s19  ;;  %s36_s11 = int_to_ptr.vmem [resolvable:$true] %s35_s11 }
  0x17   :  { %156 = dma.hbm_to_vmem [thread:$0]  %s149_s0, 512, %s151_s19, [#allocation19], %s2371_s29, %s2371_s29, %s2372_s30  }
  0x18   :  { %s60_s22 = sshll.u32 %s3095_s2, 4  ;;  %s81_s23 = sshll.u32 %s3097_s4, 4  ;;  %s61_s22 = int_to_ptr.hbm [resolvable:$true] %s60_s22  ;;  %s82_s23 = int_to_ptr.hbm [resolvable:$true] %s81_s23 }
  0x19   :  { %s33_s17 = sshll.u32 %s3111_s8, 4  ;;  %s2378_s25 = smov [#allocation8]   ;;  %s34_s17 = int_to_ptr.hbm [resolvable:$true] %s33_s17 }
  0x1a   :  { %41 = dma.hbm_to_vmem [thread:$0]  %s34_s17, 256, %s36_s11, [#allocation4], %s2371_s29, %s2371_s29, %s2372_s30  }
  0x1b   :  { %s62_s26 = sshll.u32 %s2378_s25, 4  ;;  %s2379_s27 = smov [#allocation11]   ;;  %s63_s26 = int_to_ptr.vmem [resolvable:$true] %s62_s26 }
  0x1c   :  { %65 = dma.hbm_to_vmem [thread:$0]  %s61_s22, 64, %s63_s26, [#allocation7]  }
  0x1d   :  { %s83_s0 = sshll.u32 %s2379_s27, 4  ;;  %s105_s2 = sshll.u32 %s3099_s6, 4  ;;  %s84_s0 = int_to_ptr.vmem [resolvable:$true] %s83_s0  ;;  %s106_s2 = int_to_ptr.hbm [resolvable:$true] %s105_s2 }
  0x1e   :  { %89 = dma.hbm_to_vmem [thread:$0]  %s82_s23, 512, %s84_s0, [#allocation10], %s2371_s29, %s2371_s29, %s2372_s30  }
  0x1f   :  { %s135_s4 = sshll.u32 %s3103_s10, 4  ;;  %s2380_s18 = smov [#allocation14]   ;;  %s136_s4 = int_to_ptr.hbm [resolvable:$true] %s135_s4 }
  0x20   :  { %s107_s19 = sshll.u32 %s2380_s18, 4  ;;  %s2381_s1 = smov [#allocation17]   ;;  %s108_s19 = int_to_ptr.vmem [resolvable:$true] %s107_s19 }
  0x21   :  { %113 = dma.hbm_to_vmem [thread:$0]  %s106_s2, 512, %s108_s19, [#allocation13], %s2371_s29, %s2371_s29, %s2372_s30  }
  0x22   :  { %s137_s6 = sshll.u32 %s2381_s1, 4  ;;  %s163_s21 = sshll.u32 %s3106_s13, 4  ;;  %s138_s6 = int_to_ptr.vmem [resolvable:$true] %s137_s6  ;;  %s164_s21 = int_to_ptr.hbm [resolvable:$true] %s163_s21 }
  0x23   :  { %143 = dma.hbm_to_vmem [thread:$0]  %s136_s4, 512, %s138_s6, [#allocation16], %s2371_s29, %s2371_s29, %s2372_s30  }
  0x24   :  { %s176_s3 = sshll.u32 %s3107_s14, 4  ;;  %s2382_s24 = smov [#allocation20]   ;;  %s177_s3 = int_to_ptr.hbm [resolvable:$true] %s176_s3 }
  0x25   :  { %s165_s23 = sshll.u32 %s2382_s24, 4  ;;  %s2383_s25 = smov [#allocation21]   ;;  %s166_s23 = int_to_ptr.vmem [resolvable:$true] %s165_s23 }
  0x26   :  { %171 = dma.hbm_to_vmem [thread:$0]  %s164_s21, 512, %s166_s23, [#allocation19], %s2371_s29, %s2371_s29, %s2372_s30  }
  0x27   :  { %s178_s13 = sshll.u32 %s2383_s25, 4  ;;  %s179_s13 = int_to_ptr.vmem [resolvable:$true] %s178_s13 }
  0x28   :  { %184 = dma.hbm_to_vmem [thread:$0]  %s177_s3, 512, %s179_s13, [#allocation22], %s2371_s29, %s2371_s29, %s2372_s30  }
  0x29   :  { %2354 = dma.done.wait [#allocation4], 256  }
  0x2a   :  { %2355 = vsyncadd [#allocation4], 4294967040 }
  0x2b   :  { %2356 = dma.done.wait [#allocation7], 320  }
  0x2c   :  { %2357 = vsyncadd [#allocation7], 4294966976 }
  0x2d   :  { %2358 = dma.done.wait [#allocation10], 576  }
  0x2e   :  { %2359 = vsyncadd [#allocation10], 4294966720 }
  0x2f   :  { %2360 = dma.done.wait [#allocation13], 528  }
  0x30   :  { %2361 = vsyncadd [#allocation13], 4294966768 }
  0x31   :  { %2362 = dma.done.wait [#allocation16], 1024  }
  0x32   :  { %2363 = vsyncadd [#allocation16], 4294966272 }
  0x33   :  { %2364 = dma.done.wait [#allocation19], 1024  }
  0x34   :  { %2365 = vsyncadd [#allocation19], 4294966272 }
  0x35   :  { %2366 = dma.done.wait [#allocation22], 512  }
  0x36   :  { %2367 = vsyncadd [#allocation22], 4294966784  ;;  %vm241_vm0 = vcmask 261120   ;;  %v240_v0 = vld [vmem:[#allocation6 + $0x8] sm:$0xff]  ;;  %v237_v1 = vld [vmem:[#allocation3] sm:$0xff]  ;;  %v2384_v8 = vmov 32.0  }
  0x37   :  { %v302_v2 = vsel %vm241_vm0, %v240_v0, 0.0  ;;  %v242_v3 = vsel %vm241_vm0, %v237_v1, 0.0  ;;  %v238_v4 = vld [vmem:[#allocation3 + $0x8] sm:$0xff]  ;;  %v239_v5 = vld [vmem:[#allocation6] sm:$0xff]  ;;  %1950 = vrcp.f32 %v2384_v8  ;;  %v352_v35 = vld [vmem:[#allocation11 + $0x18] sm:$0xff]  ;;  %s2385_s14 = smov 120  }
  0x38   :  { %303 = vadd.xlane.f32.xlu1 %v302_v2  ;;  %243 = vadd.xlane.f32.xlu0 %v242_v3  ;;  %v245_v6 = vsel %vm241_vm0, %v238_v4, 0.0  ;;  %v299_v7 = vsel %vm241_vm0, %v239_v5, 0.0  ;;  %v351_v36 = vld [vmem:[#allocation11 + $0x10] sm:$0xff]  ;;  %v350_v37 = vld [vmem:[#allocation11 + $0x8] sm:$0xff]  ;;  %v349_v38 = vld [vmem:[#allocation11] sm:$0xff]  ;;  %s2386_s26 = smov 112  }
  0x39   :  { %381 = vmatpush.msra.mxu0 %v352_v35  ;;  %1878 = vmatpush.msra.mxu2 %v352_v35  ;;  %v235_v60 = vld [vmem:[#allocation8] sm:$0xf]  ;;  %v236_v2 = vld [vmem:[#allocation9] sm:$0xf]  ;;  %s2387_s27 = smov 96   ;;  %s2388_s0 = smov 104  }
  0x3a   :  { %v343_v8 = vperm.slane %v235_v60, 1  ;;  %vm430_vm14 = vcmask 64512   ;;  %s2389_s5 = smov 64   ;;  %vm707_vm15 = vcmask 130048   ;;  %s2390_s28 = smov 16  }
  0x3b   :  { %382 = vmatpush.msra.mxu0 %v351_v36  ;;  %1879 = vmatpush.msra.mxu2 %v351_v36  ;;  %v1947_v36 = vld [vmem:[#allocation12] ss:$0 sm:$0xff]  ;;  %s2391_s2 = smov 24   ;;  %s1787_s20 = sshll.u32 %s3109_s16, 4  ;;  %s1788_s20 = int_to_ptr.hbm [resolvable:$true] %s1787_s20 }
  0x3d   :  { %v1951_v9 = vpop.eup %1950  ;;  %383 = vmatpush.msra.mxu0 %v350_v37  ;;  %1880 = vmatpush.msra.mxu2 %v350_v37 }
  0x3e   :  { %v249_v10 = vmul.f32 32.0, %v1951_v9  ;;  %vm253_vm1 = vweird.f32 %v1951_v9 }
  0x3f   :  { %384 = vmatpush.msra.mxu0 %v349_v38  ;;  %1881 = vmatpush.msra.mxu2 %v349_v38 }
  0x40   :  { %246 = vadd.xlane.f32.xlu1 %v245_v6  ;;  %300 = vadd.xlane.f32.xlu0 %v299_v7  ;;  %v250_v11 = vsub.f32 1.0, %v249_v10 }
  0x42   :  { %v251_v12 = vmul.f32 %v1951_v9, %v250_v11 }
  0x44   :  { %v252_v13 = vadd.f32 %v1951_v9, %v251_v12  ;;  %v296_v12 = vperm.slane %v236_v2, 0 }
  0x46   :  { %v2545_v14 = vsel %vm253_vm1, %v1951_v9, %v252_v13  ;;  %vm1220_vm1 = vcmask 195584  }
  0xab   :  { %v304_v15 = vpop.xlane.xlu1 %303  ;;  %v244_v16 = vpop.xlane.xlu0 %243 }
  0xac   :  { %v306_v17 = vmul.f32 %v304_v15, %v2545_v14  ;;  %v255_v18 = vmul.f32 %v2545_v14, %v244_v16  ;;  %v346_v16 = vperm.slane %v236_v2, 1 }
  0xae   :  { %v2549_v19 = vsub.f32 %v240_v0, %v306_v17  ;;  %v2551_v20 = vsub.f32 %v237_v1, %v255_v18 }
  0xb0   :  { %v310_v21 = vmul.f32 %v2549_v19, %v2549_v19  ;;  %v259_v22 = vmul.f32 %v2551_v20, %v2551_v20 }
  0xb2   :  { %v314_v23 = vsel %vm241_vm0, %v310_v21, 0.0  ;;  %v261_v24 = vsel %vm241_vm0, %v259_v22, 0.0 }
  0xb3   :  { %v247_v25 = vpop.xlane.xlu1 %246  ;;  %315 = vadd.xlane.f32.xlu0 %v314_v23  ;;  %262 = vadd.xlane.f32.xlu2 %v261_v24  ;;  %v301_v26 = vpop.xlane.xlu0 %300 }
  0xb4   :  { %v256_v27 = vmul.f32 %v2545_v14, %v247_v25  ;;  %v305_v28 = vmul.f32 %v301_v26, %v2545_v14 }
  0xb6   :  { %v2561_v29 = vsub.f32 %v238_v4, %v256_v27  ;;  %v2563_v30 = vsub.f32 %v239_v5, %v305_v28  ;;  %v293_v5 = vperm.slane %v235_v60, 0 }
  0xb8   :  { %v260_v31 = vmul.f32 %v2561_v29, %v2561_v29  ;;  %v309_v32 = vmul.f32 %v2563_v30, %v2563_v30 }
  0xba   :  { %v264_v33 = vsel %vm241_vm0, %v260_v31, 0.0  ;;  %v311_v34 = vsel %vm241_vm0, %v309_v32, 0.0 }
  0xbb   :  { %265 = vadd.xlane.f32.xlu1 %v264_v33  ;;  %312 = vadd.xlane.f32.xlu2 %v311_v34 }
 0x126   :  { %v263_v39 = vpop.xlane.xlu2 %262  ;;  %v316_v40 = vpop.xlane.xlu0 %315 }
 0x127   :  { %v267_v41 = vmul.f32 %v263_v39, %v2545_v14  ;;  %v318_v42 = vmul.f32 %v316_v40, %v2545_v14 }
 0x129   :  { %v269_v43 = vadd.f32 1e-05, %v267_v41  ;;  %v320_v44 = vadd.f32 1e-05, %v318_v42 }
 0x12b   :  { %1952 = vrsqrt.f32 %v269_v43  ;;  %vm277_vm4 = vweird.f32 %v269_v43  ;;  %vm337_vm6 = vweird.f32 %v320_v44 }
 0x12c   :  { %1954 = vrsqrt.f32 %v320_v44 }
 0x12e   :  { %v266_v45 = vpop.xlane.xlu1 %265  ;;  %v313_v46 = vpop.xlane.xlu2 %312 }
 0x12f   :  { %v268_v47 = vmul.f32 %v266_v45, %v2545_v14  ;;  %v317_v48 = vmul.f32 %v313_v46, %v2545_v14 }
 0x131   :  { %v1953_v49 = vpop.eup %1952  ;;  %v270_v50 = vadd.f32 1e-05, %v268_v47  ;;  %v319_v51 = vadd.f32 1e-05, %v317_v48 }
 0x132   :  { %v1955_v52 = vpop.eup %1954  ;;  %v272_v53 = vmul.f32 %v1953_v49, %v269_v43  ;;  %vm278_vm2 = vweird.f32 %v1953_v49 }
 0x133   :  { %v332_v54 = vmul.f32 %v1955_v52, %v320_v44  ;;  %1956 = vrsqrt.f32 %v270_v50  ;;  %vm338_vm3 = vweird.f32 %v1955_v52  ;;  %vm279_vm5 = vmor %vm277_vm4, %vm278_vm2  ;;  %vm287_vm8 = vweird.f32 %v270_v50 }
 0x134   :  { %v273_v55 = vmul.f32 %v1953_v49, %v272_v53  ;;  %1958 = vrsqrt.f32 %v319_v51  ;;  %vm339_vm7 = vmor %vm337_vm6, %vm338_vm3  ;;  %vm327_vm10 = vweird.f32 %v319_v51 }
 0x135   :  { %v333_v56 = vmul.f32 %v1955_v52, %v332_v54 }
 0x136   :  { %v274_v57 = vmul.f32 0.5, %v273_v55 }
 0x137   :  { %v334_v58 = vmul.f32 0.5, %v333_v56 }
 0x138   :  { %v275_v59 = vsub.f32 1.5, %v274_v57 }
 0x139   :  { %v1957_v61 = vpop.eup %1956  ;;  %v335_v62 = vsub.f32 1.5, %v334_v58 }
 0x13a   :  { %v1959_v63 = vpop.eup %1958  ;;  %v276_v0 = vmul.f32 %v1953_v49, %v275_v59  ;;  %v282_v1 = vmul.f32 %v1957_v61, %v270_v50  ;;  %vm288_vm9 = vweird.f32 %v1957_v61 }
 0x13b   :  { %v336_v3 = vmul.f32 %v1955_v52, %v335_v62  ;;  %v322_v4 = vmul.f32 %v1959_v63, %v319_v51  ;;  %vm328_vm11 = vweird.f32 %v1959_v63  ;;  %vm289_vm12 = vmor %vm287_vm8, %vm288_vm9 }
 0x13c   :  { %v280_v6 = vsel %vm279_vm5, %v1953_v49, %v276_v0  ;;  %v283_v7 = vmul.f32 %v1957_v61, %v282_v1  ;;  %vm329_vm13 = vmor %vm327_vm10, %vm328_vm11 }
 0x13d   :  { %v340_v9 = vsel %vm339_vm7, %v1955_v52, %v336_v3  ;;  %v323_v10 = vmul.f32 %v1959_v63, %v322_v4  ;;  %v291_v11 = vmul.f32 %v280_v6, %v2551_v20 }
 0x13e   :  { %v284_v13 = vmul.f32 0.5, %v283_v7  ;;  %v342_v15 = vmul.f32 %v340_v9, %v2549_v19 }
 0x13f   :  { %v324_v17 = vmul.f32 0.5, %v323_v10  ;;  %v294_v18 = vmul.f32 %v293_v5, %v291_v11 }
 0x140   :  { %v285_v21 = vsub.f32 1.5, %v284_v13  ;;  %v345_v22 = vmul.f32 %v343_v8, %v342_v15 }
 0x141   :  { %v325_v23 = vsub.f32 1.5, %v324_v17  ;;  %v2577_v24 = vadd.f32 %v296_v12, %v294_v18 }
 0x142   :  { %v2579_v25 = vadd.f32 %v346_v16, %v345_v22  ;;  %v286_v26 = vmul.f32 %v1957_v61, %v285_v21 }
 0x143   :  { %v326_v20 = vmul.f32 %v1959_v63, %v325_v23  ;;  %1806 = vmatmul.msk.f32.vlgmr.msra.gmra.mxu0 %vm241_vm0, %v2577_v24 }
 0x144   :  { %1809 = vmatmul.msk.f32.vlgmr.msra.gmra.mxu2 %vm241_vm0, %v2579_v25  ;;  %v290_v28 = vsel %vm289_vm12, %v1957_v61, %v286_v26 }
 0x145   :  { %v330_v19 = vsel %vm329_vm13, %v1959_v63, %v326_v20  ;;  %v292_v33 = vmul.f32 %v290_v28, %v2561_v29 }
 0x146   :  { %v341_v27 = vmul.f32 %v330_v19, %v2563_v30 }
 0x147   :  { %v295_v34 = vmul.f32 %v293_v5, %v292_v33 }
 0x148   :  { %v344_v31 = vmul.f32 %v343_v8, %v341_v27 }
 0x149   :  { %v2591_v35 = vadd.f32 %v296_v12, %v295_v34 }
 0x14a   :  { %v2586_v32 = vadd.f32 %v346_v16, %v344_v31 }
 0x14c   :  { %1807 = vmatmul.msk.f32.gmra.mxu0 %vm241_vm0, %v2586_v32 }
 0x154   :  { %1808 = vmatmul.msk.f32.gmra.mxu0 %vm241_vm0, %v2591_v35 }
 0x1c0   :  { %v386_v37 = vpop.f32.mrf.mxu0 }
 0x1c1   :  { %v2595_v38 = vadd.f32 %v1947_v36, %v386_v37 }
 0x1c3   :  { %402 = vrot.lane.b32.xlu0 %v2595_v38, %s2385_s14 }
 0x1c7   :  { %v395_v30 = vpop.f32.mrf.mxu2 }
 0x1c8   :  { %v2598_v39 = vadd.f32 %v1947_v36, %v395_v30 }
 0x1c9   :  { %v389_v29 = vpop.f32.mrf.mxu0 }
 0x1ca   :  { %v390_v40 = vadd.f32 %v1947_v36, %v389_v29 }
 0x1cb   :  { %408 = vrot.lane.b32.xlu0 %v2598_v39, %s2385_s14 }
 0x1cc   :  { %412 = vrot.lane.b32.xlu1 %v390_v40, %s2386_s26  ;;  %404 = vrot.lane.b32.xlu2 %v390_v40, %s2385_s14  ;;  %v1907_v58 = vpack.i.bf16 %v2595_v38, %v390_v40 }
 0x1d1   :  { %v392_v41 = vpop.f32.mrf.mxu0 }
 0x1d2   :  { %v393_v42 = vadd.f32 %v1947_v36, %v392_v41 }
 0x1d3   :  { %428 = vrot.lane.b32.xlu0 %v390_v40, %s2387_s27 }
 0x1d4   :  { %416 = vrot.lane.b32.xlu1 %v2598_v39, %s2386_s26  ;;  %410 = vrot.lane.b32.xlu2 %v2595_v38, %s2386_s26 }
 0x1db   :  { %406 = vrot.lane.b32.xlu0 %v393_v42, %s2385_s14 }
 0x1dc   :  { %414 = vrot.lane.b32.xlu1 %v393_v42, %s2386_s26  ;;  %418 = vrot.lane.b32.xlu2 %v2595_v38, %s2388_s0 }
 0x1e3   :  { %462 = vrot.lane.b32.xlu0 %v393_v42, %s2387_s27 }
 0x1e4   :  { %426 = vrot.lane.b32.xlu1 %v2595_v38, %s2387_s27  ;;  %420 = vrot.lane.b32.xlu2 %v390_v40, %s2388_s0 }
 0x1eb   :  { %422 = vrot.lane.b32.xlu0 %v393_v42, %s2388_s0 }
 0x1ec   :  { %464 = vrot.lane.b32.xlu2 %v2598_v39, %s2387_s27 }
 0x1f4   :  { %424 = vrot.lane.b32.xlu2 %v2598_v39, %s2388_s0 }
 0x226   :  { %v405_v43 = vpop.permute.xlu2 %404 }
 0x227   :  { %499 = vrot.lane.b32.xlu1 %v405_v43, %s2387_s27 }
 0x22e   :  { %v2616_v44 = vpop.permute.xlu2 %410 }
 0x22f   :  { %567 = vrot.lane.b32.xlu0 %v2616_v44, %s2387_s27  ;;  %v1922_v61 = vpack.i.bf16 %v2616_v44, %v393_v42 }
 0x235   :  { %v403_v45 = vpop.permute.xlu0 %402 }
 0x236   :  { %v2620_v46 = vpop.permute.xlu2 %418  ;;  %497 = vrot.lane.b32.xlu2 %v403_v45, %s2387_s27  ;;  %v1912_v62 = vpack.i.bf16 %v403_v45, %v405_v43 }
 0x23d   :  { %v2623_v47 = vpop.permute.xlu0 %408 }
 0x23e   :  { %v2625_v48 = vpop.permute.xlu1 %412  ;;  %v2627_v49 = vpop.permute.xlu2 %420  ;;  %534 = vrot.lane.b32.xlu2 %v2623_v47, %s2387_s27 }
 0x23f   :  { %569 = vrot.lane.b32.xlu1 %v2625_v48, %s2387_s27  ;;  %v1917_v59 = vpack.i.bf16 %v2625_v48, %v2598_v39 }
 0x245   :  { %v429_v50 = vpop.permute.xlu0 %428 }
 0x246   :  { %v2633_v51 = vpop.permute.xlu1 %416  ;;  %v465_v52 = vpop.permute.xlu2 %464  ;;  %1810 = vmatpush.xpose.msk.msra.mxu1 %vm430_vm14, %v429_v50  ;;  %1882 = vmatpush.xpose.msk.msra.mxu3 %vm430_vm14, %v429_v50 }
 0x247   :  { %639 = vrot.lane.b32.xlu1 %v2627_v49, %s2387_s27  ;;  %1814 = vmatpush.xpose.msk.msrb.mxu2 %vm430_vm14, %v465_v52 }
 0x248   :  { %604 = vrot.lane.b32.xlu0 %v2633_v51, %s2387_s27 }
 0x24d   :  { %v2642_v53 = vpop.permute.xlu0 %406 }
 0x24e   :  { %v2644_v54 = vpop.permute.xlu1 %414  ;;  %532 = vrot.lane.b32.xlu2 %v2642_v53, %s2387_s27  ;;  %v2652_v55 = vpop.permute.xlu2 %424 }
 0x24f   :  { %637 = vrot.lane.b32.xlu1 %v2620_v46, %s2387_s27 }
 0x250   :  { %602 = vrot.lane.b32.xlu0 %v2644_v54, %s2387_s27 }
 0x255   :  { %v463_v56 = vpop.permute.xlu0 %462 }
 0x256   :  { %v427_v57 = vpop.permute.xlu1 %426  ;;  %674 = vrot.lane.b32.xlu2 %v2652_v55, %s2387_s27  ;;  %1815 = vmatpush.xpose.msk.msrb.mxu2 %vm430_vm14, %v463_v56 }
 0x257   :  { %1811 = vmatpush.xpose.msk.msra.mxu1 %vm430_vm14, %v427_v57  ;;  %1883 = vmatpush.xpose.msk.msra.mxu3 %vm430_vm14, %v427_v57 }
 0x258   :  { %1908 = vrot.lane.b32.xlu0 %v1907_v58, %s2389_s5 }
 0x259   :  { %1816 = vmatmul.msk.f32.vlgmr.msrb.gmra.mxu2 %vm430_vm14, %v393_v42 }
 0x25a   :  { %1812 = vmatmul.msk.f32.vlgmr.msra.gmra.mxu1 %vm430_vm14, %v2595_v38  ;;  %1813 = vmatmul.msk.f32.vlgmr.msra.gmra.mxu3 %vm430_vm14, %v390_v40 }
 0x25d   :  { %v2667_v60 = vpop.permute.xlu0 %422 }
 0x25e   :  { %1918 = vrot.lane.b32.xlu2 %v1917_v59, %s2389_s5  ;;  %672 = vrot.lane.b32.xlu1 %v2667_v60, %s2387_s27 }
 0x260   :  { %1923 = vrot.lane.b32.xlu0 %v1922_v61, %s2389_s5 }
 0x261   :  { %1817 = vmatmul.msk.f32.gmra.mxu2 %vm430_vm14, %v2598_v39 }
 0x266   :  { %1913 = vrot.lane.b32.xlu1 %v1912_v62, %s2389_s5 }
 0x290   :  { %v498_v63 = vpop.permute.xlu2 %497 }
 0x298   :  { %v535_v0 = vpop.permute.xlu2 %534 }
 0x299   :  { %v500_v1 = vpop.permute.xlu1 %499  ;;  %1822 = vmatpush.xpose.msk.msrb.mxu1 %vm430_vm14, %v535_v0 }
 0x29a   :  { %1818 = vmatpush.xpose.msk.msrb.mxu3 %vm430_vm14, %v500_v1 }
 0x29e   :  { %1819 = vmatpush.xpose.msk.msrb.mxu3 %vm430_vm14, %v498_v63 }
 0x2a1   :  { %1820 = vmatmul.msk.f32.vlgmr.msrb.gmra.mxu3 %vm430_vm14, %v403_v45  ;;  %v568_v5 = vpop.permute.xlu0 %567 }
 0x2a8   :  { %v533_v2 = vpop.permute.xlu2 %532 }
 0x2a9   :  { %1821 = vmatmul.msk.f32.gmra.mxu3 %vm430_vm14, %v405_v43  ;;  %1823 = vmatpush.xpose.msk.msrb.mxu1 %vm430_vm14, %v533_v2 }
 0x2ac   :  { %1824 = vmatmul.msk.f32.vlgmr.msrb.gmra.mxu1 %vm430_vm14, %v2642_v53 }
 0x2b0   :  { %v675_v3 = vpop.permute.xlu2 %674 }
 0x2b1   :  { %v570_v4 = vpop.permute.xlu1 %569  ;;  %1838 = vmatpush.xpose.msk.msra.mxu1 %vm430_vm14, %v675_v3 }
 0x2b2   :  { %1826 = vmatpush.xpose.msk.msra.mxu2 %vm430_vm14, %v570_v4 }
 0x2b4   :  { %1825 = vmatmul.msk.f32.gmra.mxu1 %vm430_vm14, %v2623_v47 }
 0x2b6   :  { %1827 = vmatpush.xpose.msk.msra.mxu2 %vm430_vm14, %v568_v5 }
 0x2b8   :  { %v1919_v8 = vpop.permute.xlu2 %1918 }
 0x2b9   :  { %v640_v6 = vpop.permute.xlu1 %639  ;;  %1828 = vmatmul.msk.f32.vlgmr.msra.gmra.mxu2 %vm430_vm14, %v2616_v44  ;;  %v1920_v10 = vunpack.i.l.bf16 %v1919_v8  ;;  %v1921_v16 = vunpack.i.h.bf16 %v1919_v8 }
 0x2ba   :  { %v605_v7 = vpop.permute.xlu0 %604  ;;  %1834 = vmatpush.xpose.msk.msrb.mxu0 %vm430_vm14, %v640_v6 }
 0x2bb   :  { %1830 = vmatpush.xpose.msk.msra.mxu3 %vm430_vm14, %v605_v7 }
 0x2c1   :  { %v638_v9 = vpop.permute.xlu1 %637  ;;  %1829 = vmatmul.msk.f32.gmra.mxu2 %vm430_vm14, %v2625_v48 }
 0x2c2   :  { %v603_v11 = vpop.permute.xlu0 %602  ;;  %1835 = vmatpush.xpose.msk.msrb.mxu0 %vm430_vm14, %v638_v9 }
 0x2c3   :  { %1831 = vmatpush.xpose.msk.msra.mxu3 %vm430_vm14, %v603_v11 }
 0x2c5   :  { %1836 = vmatmul.msk.f32.vlgmr.msrb.gmra.mxu0 %vm430_vm14, %v2620_v46 }
 0x2c6   :  { %1832 = vmatmul.msk.f32.vlgmr.msra.gmra.mxu3 %vm430_vm14, %v2644_v54 }
 0x2c7   :  { %945 = vmatpush.msrb.mxu3 %v1920_v10 }
 0x2ca   :  { %v1909_v12 = vpop.permute.xlu0 %1908 }
 0x2cb   :  { %v1910_v13 = vunpack.i.l.bf16 %v1909_v12  ;;  %v1911_v15 = vunpack.i.h.bf16 %v1909_v12 }
 0x2cd   :  { %910 = vmatpush.msrb.mxu2 %v1910_v13  ;;  %1837 = vmatmul.msk.f32.gmra.mxu0 %vm430_vm14, %v2627_v49 }
 0x2ce   :  { %1833 = vmatmul.msk.f32.gmra.mxu3 %vm430_vm14, %v2633_v51 }
 0x2cf   :  { %911 = vmatpush.msrb.mxu2 %v1911_v15 }
 0x2d0   :  { %v673_v17 = vpop.permute.xlu1 %672 }
 0x2d1   :  { %1050 = vmatpush.msra.mxu2 %v1921_v16  ;;  %1839 = vmatpush.xpose.msk.msra.mxu1 %vm430_vm14, %v673_v17 }
 0x2d2   :  { %v1924_v18 = vpop.permute.xlu0 %1923 }
 0x2d3   :  { %v1926_v21 = vunpack.i.h.bf16 %v1924_v18  ;;  %v1925_v22 = vunpack.i.l.bf16 %v1924_v18 }
 0x2d4   :  { %1840 = vmatmul.msk.f32.vlgmr.msra.gmra.mxu1 %vm430_vm14, %v2667_v60 }
 0x2d5   :  { %946 = vmatpush.msrb.mxu3 %v1925_v22  ;;  %1051 = vmatpush.msra.mxu2 %v1926_v21 }
 0x2d7   :  { %v456_v23 = vpop.f32.mrf.mxu1 }
 0x2d8   :  { %v708_v26 = vsel %vm707_vm15, %v456_v23, -inf  ;;  %v1914_v20 = vpop.permute.xlu1 %1913 }
 0x2d9   :  { %709 = vmax.xlane.f32.xlu0 %v708_v26  ;;  %v1915_v19 = vunpack.i.l.bf16 %v1914_v20  ;;  %v1916_v27 = vunpack.i.h.bf16 %v1914_v20 }
 0x2db   :  { %980 = vmatpush.msra.mxu0 %v1915_v19 }
 0x2dc   :  { %v491_v28 = vpop.f32.mrf.mxu2  ;;  %1841 = vmatmul.msk.f32.gmra.mxu1 %vm430_vm14, %v2652_v55 }
 0x2dd   :  { %v459_v31 = vpop.f32.mrf.mxu3  ;;  %981 = vmatpush.msra.mxu0 %v1916_v27  ;;  %v714_v33 = vsel %vm707_vm15, %v491_v28, -inf }
 0x2de   :  { %715 = vmax.xlane.f32.xlu2 %v714_v33  ;;  %v711_v34 = vsel %vm707_vm15, %v459_v31, -inf }
 0x2df   :  { %712 = vmax.xlane.f32.xlu1 %v711_v34 }
 0x2e4   :  { %v494_v36 = vpop.f32.mrf.mxu2 }
 0x2e5   :  { %v717_v37 = vsel %vm707_vm15, %v494_v36, -inf }
 0x2e7   :  { %718 = vmax.xlane.f32.xlu1 %v717_v37 }
 0x324   :  { %v2715_v38 = vpop.f32.mrf.mxu3 }
 0x325   :  { %v720_v57 = vsel %vm707_vm15, %v2715_v38, -inf }
 0x329   :  { %v2717_v30 = vpop.f32.mrf.mxu1 }
 0x32a   :  { %v726_v39 = vsel %vm707_vm15, %v2717_v30, -inf }
 0x32b   :  { %727 = vmax.xlane.f32.xlu0 %v726_v39 }
 0x32c   :  { %v2721_v29 = vpop.f32.mrf.mxu3 }
 0x32d   :  { %v723_v40 = vsel %vm707_vm15, %v2721_v29, -inf }
 0x331   :  { %v2739_v52 = vpop.f32.mrf.mxu1 }
 0x332   :  { %v729_v4 = vsel %vm707_vm15, %v2739_v52, -inf }
 0x333   :  { %724 = vmax.xlane.f32.xlu0 %v723_v40 }
 0x33c   :  { %v2725_v41 = vpop.f32.mrf.mxu2 }
 0x33d   :  { %v732_v42 = vsel %vm707_vm15, %v2725_v41, -inf }
 0x33e   :  { %733 = vmax.xlane.f32.xlu1 %v732_v42 }
 0x342   :  { %v2729_v43 = vpop.f32.mrf.mxu0 }
 0x343   :  { %v744_v44 = vsel %vm707_vm15, %v2729_v43, -inf }
 0x344   :  { %745 = vmax.xlane.f32.xlu2 %v744_v44  ;;  %v2733_v45 = vpop.f32.mrf.mxu2 }
 0x345   :  { %v735_v48 = vsel %vm707_vm15, %v2733_v45, -inf }
 0x346   :  { %736 = vmax.xlane.f32.xlu0 %v735_v48 }
 0x349   :  { %v2737_v50 = vpop.f32.mrf.mxu3 }
 0x34a   :  { %v2741_v56 = vpop.f32.mrf.mxu0  ;;  %v738_v62 = vsel %vm707_vm15, %v2737_v50, -inf }
 0x34b   :  { %v747_v58 = vsel %vm707_vm15, %v2741_v56, -inf }
 0x34c   :  { %721 = vmax.xlane.f32.xlu2 %v720_v57  ;;  %748 = vmax.xlane.f32.xlu1 %v747_v58  ;;  %v710_v59 = vpop.xlane.xlu0 %709 }
 0x34d   :  { %v756_v61 = vsub.f32 %v456_v23, %v710_v59 }
 0x34e   :  { %739 = vmax.xlane.f32.xlu0 %v738_v62 }
 0x34f   :  { %v772_v63 = vmul.f32 1.442695, %v756_v61 }
 0x351   :  { %v2749_v0 = vpop.f32.mrf.mxu3  ;;  %1960 = vpow2.f32 %v772_v63  ;;  %v2751_v1 = vpop.f32.mrf.mxu1 }
 0x352   :  { %v713_v2 = vpop.xlane.xlu1 %712  ;;  %v741_v5 = vsel %vm707_vm15, %v2749_v0, -inf  ;;  %v716_v11 = vpop.xlane.xlu2 %715  ;;  %v750_v21 = vsel %vm707_vm15, %v2751_v1, -inf }
 0x353   :  { %v757_v3 = vsub.f32 %v459_v31, %v713_v2  ;;  %v758_v13 = vsub.f32 %v491_v28, %v716_v11 }
 0x354   :  { %730 = vmax.xlane.f32.xlu2 %v729_v4  ;;  %742 = vmax.xlane.f32.xlu1 %v741_v5 }
 0x355   :  { %v774_v6 = vmul.f32 1.442695, %v757_v3  ;;  %v776_v16 = vmul.f32 1.442695, %v758_v13 }
 0x357   :  { %v2757_v7 = vpop.eup %1960  ;;  %1962 = vpow2.f32 %v774_v6 }
 0x358   :  { %v804_v10 = vsel %vm707_vm15, %v2757_v7, 0.0  ;;  %1964 = vpow2.f32 %v776_v16 }
 0x359   :  { %v2759_v8 = vpop.f32.mrf.mxu1 }
 0x35a   :  { %v753_v9 = vsel %vm707_vm15, %v2759_v8, -inf  ;;  %v719_v17 = vpop.xlane.xlu1 %718 }
 0x35b   :  { %754 = vmax.xlane.f32.xlu0 %v753_v9  ;;  %v759_v18 = vsub.f32 %v494_v36, %v719_v17 }
 0x35c   :  { %805 = vadd.xlane.f32.xlu2 %v804_v10 }
 0x35d   :  { %v2765_v12 = vpop.eup %1962  ;;  %v778_v22 = vmul.f32 1.442695, %v759_v18 }
 0x35e   :  { %v807_v15 = vsel %vm707_vm15, %v2765_v12, 0.0  ;;  %v2771_v23 = vpop.eup %1964 }
 0x35f   :  { %1966 = vpow2.f32 %v778_v22  ;;  %v810_v26 = vsel %vm707_vm15, %v2771_v23, 0.0 }
 0x364   :  { %808 = vadd.xlane.f32.xlu2 %v807_v15 }
 0x365   :  { %v2775_v20 = vpop.eup %1966 }
 0x366   :  { %v813_v19 = vsel %vm707_vm15, %v2775_v20, 0.0 }
 0x36c   :  { %751 = vmax.xlane.f32.xlu2 %v750_v21 }
 0x374   :  { %811 = vadd.xlane.f32.xlu2 %v810_v26 }
 0x37c   :  { %814 = vadd.xlane.f32.xlu2 %v813_v19 }
 0x39e   :  { %v728_v27 = vpop.xlane.xlu0 %727 }
 0x39f   :  { %v762_v28 = vsub.f32 %v2717_v30, %v728_v27 }
 0x3a1   :  { %v784_v31 = vmul.f32 1.442695, %v762_v28 }
 0x3a3   :  { %1968 = vpow2.f32 %v784_v31 }
 0x3a6   :  { %v725_v57 = vpop.xlane.xlu0 %724 }
 0x3a7   :  { %v761_v15 = vsub.f32 %v2721_v29, %v725_v57  ;;  %v1927_v29 = vpack.i.bf16 %v2627_v49, %v2623_v47 }
 0x3a9   :  { %v2780_v33 = vpop.eup %1968  ;;  %v782_v18 = vmul.f32 1.442695, %v761_v15 }
 0x3aa   :  { %v822_v34 = vsel %vm707_vm15, %v2780_v33, 0.0 }
 0x3ab   :  { %823 = vadd.xlane.f32.xlu2 %v822_v34 }
 0x3b1   :  { %v734_v36 = vpop.xlane.xlu1 %733 }
 0x3b2   :  { %v764_v37 = vsub.f32 %v2725_v41, %v734_v36  ;;  %v1932_v41 = vpack.i.bf16 %v2620_v46, %v2642_v53 }
 0x3b4   :  { %v788_v39 = vmul.f32 1.442695, %v764_v37 }
 0x3b6   :  { %1970 = vpow2.f32 %v788_v39 }
 0x3b7   :  { %v746_v40 = vpop.xlane.xlu2 %745 }
 0x3b8   :  { %v768_v42 = vsub.f32 %v2729_v43, %v746_v40 }
 0x3b9   :  { %v737_v63 = vpop.xlane.xlu0 %736 }
 0x3ba   :  { %v796_v44 = vmul.f32 1.442695, %v768_v42 }
 0x3bc   :  { %v2786_v48 = vpop.eup %1970  ;;  %1972 = vpow2.f32 %v796_v44 }
 0x3bd   :  { %v828_v30 = vsel %vm707_vm15, %v2786_v48, 0.0 }
 0x3be   :  { %829 = vadd.xlane.f32.xlu0 %v828_v30 }
 0x3bf   :  { %v722_v58 = vpop.xlane.xlu2 %721  ;;  %v749_v44 = vpop.xlane.xlu1 %748 }
 0x3c0   :  { %v760_v59 = vsub.f32 %v2715_v38, %v722_v58  ;;  %v765_v38 = vsub.f32 %v2733_v45, %v737_v63  ;;  %v769_v30 = vsub.f32 %v2741_v56, %v749_v44 }
 0x3c1   :  { %v740_v21 = vpop.xlane.xlu0 %739 }
 0x3c2   :  { %v2793_v61 = vpop.eup %1972  ;;  %v780_v62 = vmul.f32 1.442695, %v760_v59  ;;  %v790_v53 = vmul.f32 1.442695, %v765_v38  ;;  %v766_v19 = vsub.f32 %v2737_v50, %v740_v21  ;;  %v798_v57 = vmul.f32 1.442695, %v769_v30 }
 0x3c3   :  { %v840_v43 = vsel %vm707_vm15, %v2793_v61, 0.0  ;;  %1933 = vrot.lane.b32.xlu2 %v1932_v41, %s2389_s5 }
 0x3c4   :  { %1974 = vpow2.f32 %v780_v62  ;;  %841 = vadd.xlane.f32.xlu1 %v840_v43  ;;  %v792_v28 = vmul.f32 1.442695, %v766_v19  ;;  %v1937_v62 = vpack.i.bf16 %v2644_v54, %v2633_v51 }
 0x3c7   :  { %v731_v2 = vpop.xlane.xlu2 %730  ;;  %v743_v58 = vpop.xlane.xlu1 %742 }
 0x3c8   :  { %v763_v3 = vsub.f32 %v2739_v52, %v731_v2  ;;  %v767_v59 = vsub.f32 %v2749_v0, %v743_v58 }
 0x3ca   :  { %v2799_v4 = vpop.eup %1974  ;;  %v786_v5 = vmul.f32 1.442695, %v763_v3  ;;  %v794_v41 = vmul.f32 1.442695, %v767_v59 }
 0x3cb   :  { %v816_v46 = vsel %vm707_vm15, %v2799_v4, 0.0 }
 0x3cc   :  { %1976 = vpow2.f32 %v786_v5  ;;  %817 = vadd.xlane.f32.xlu1 %v816_v46 }
 0x3ce   :  { %v755_v0 = vpop.xlane.xlu0 %754 }
 0x3cf   :  { %v806_v6 = vpop.xlane.xlu2 %805  ;;  %v771_v43 = vsub.f32 %v2759_v8, %v755_v0 }
 0x3d0   :  { %1978 = vrcp.f32 %v806_v6 }
 0x3d1   :  { %1980 = vpow2.f32 %v790_v53  ;;  %v802_v63 = vmul.f32 1.442695, %v771_v43 }
 0x3d2   :  { %v2804_v9 = vpop.eup %1976 }
 0x3d3   :  { %v825_v10 = vsel %vm707_vm15, %v2804_v9, 0.0 }
 0x3d4   :  { %826 = vadd.xlane.f32.xlu0 %v825_v10 }
 0x3d6   :  { %v1979_v52 = vpop.eup %1978 }
 0x3d7   :  { %v868_v11 = vmul.f32 %v1979_v52, %v2757_v7  ;;  %v809_v45 = vpop.xlane.xlu2 %808  ;;  %v2809_v13 = vpop.eup %1980 }
 0x3d8   :  { %1982 = vrcp.f32 %v809_v45  ;;  %v831_v16 = vsel %vm707_vm15, %v2809_v13, 0.0 }
 0x3d9   :  { %1842 = vmatmul.msk.f32.vlgmr.msrb.gmra.mxu2 %vm707_vm15, %v868_v11  ;;  %1984 = vpow2.f32 %v782_v18 }
 0x3dc   :  { %832 = vadd.xlane.f32.xlu0 %v831_v16 }
 0x3de   :  { %v1983_v17 = vpop.eup %1982 }
 0x3df   :  { %v752_v22 = vpop.xlane.xlu2 %751  ;;  %v869_v26 = vmul.f32 %v1983_v17, %v2765_v12  ;;  %v2822_v34 = vpop.eup %1984 }
 0x3e0   :  { %v770_v7 = vsub.f32 %v2751_v1, %v752_v22  ;;  %v819_v50 = vsel %vm707_vm15, %v2822_v34, 0.0 }
 0x3e1   :  { %1843 = vmatmul.msk.f32.gmra.mxu2 %vm707_vm15, %v869_v26 }
 0x3e2   :  { %v800_v27 = vmul.f32 1.442695, %v770_v7 }
 0x3e4   :  { %1986 = vpow2.f32 %v800_v27 }
 0x3e5   :  { %1928 = vrot.lane.b32.xlu1 %v1927_v29, %s2389_s5 }
 0x3e7   :  { %v812_v31 = vpop.xlane.xlu2 %811 }
 0x3e8   :  { %1988 = vrcp.f32 %v812_v31 }
 0x3e9   :  { %1990 = vpow2.f32 %v792_v28 }
 0x3ea   :  { %v2824_v12 = vpop.eup %1986 }
 0x3eb   :  { %v846_v1 = vsel %vm707_vm15, %v2824_v12, 0.0 }
 0x3ec   :  { %847 = vadd.xlane.f32.xlu0 %v846_v1  ;;  %820 = vadd.xlane.f32.xlu2 %v819_v50 }
 0x3ee   :  { %v1989_v47 = vpop.eup %1988 }
 0x3ef   :  { %v870_v49 = vmul.f32 %v1989_v47, %v2771_v23  ;;  %v815_v36 = vpop.xlane.xlu2 %814  ;;  %v2831_v37 = vpop.eup %1990  ;;  %v1942_v23 = vpack.i.bf16 %v2667_v60, %v2652_v55 }
 0x3f0   :  { %1992 = vrcp.f32 %v815_v36  ;;  %v834_v39 = vsel %vm707_vm15, %v2831_v37, 0.0 }
 0x3f1   :  { %1844 = vmatmul.msk.f32.vlgmr.msrb.gmra.mxu3 %vm707_vm15, %v870_v49  ;;  %1994 = vpow2.f32 %v798_v57 }
 0x3f2   :  { %1996 = vpow2.f32 %v794_v41 }
 0x3f3   :  { %1998 = vpow2.f32 %v802_v63 }
 0x3f4   :  { %835 = vadd.xlane.f32.xlu2 %v834_v39 }
 0x3f6   :  { %v1993_v40 = vpop.eup %1992 }
 0x3f7   :  { %v871_v42 = vmul.f32 %v1993_v40, %v2775_v20  ;;  %v2845_v20 = vpop.eup %1994 }
 0x3f8   :  { %v843_v56 = vsel %vm707_vm15, %v2845_v20, 0.0  ;;  %v2850_v55 = vpop.eup %1996 }
 0x3f9   :  { %1845 = vmatmul.msk.f32.gmra.mxu3 %vm707_vm15, %v871_v42  ;;  %v837_v60 = vsel %vm707_vm15, %v2850_v55, 0.0  ;;  %v2855_v51 = vpop.eup %1998 }
 0x3fa   :  { %v849_v2 = vsel %vm707_vm15, %v2855_v51, 0.0 }
 0x400   :  { %1943 = vrot.lane.b32.xlu0 %v1942_v23, %s2389_s5 }
 0x40c   :  { %1938 = vrot.lane.b32.xlu2 %v1937_v62, %s2389_s5 }
 0x40f   :  { %844 = vadd.xlane.f32.xlu1 %v843_v56 }
 0x417   :  { %838 = vadd.xlane.f32.xlu1 %v837_v60 }
 0x41e   :  { %v824_v10 = vpop.xlane.xlu2 %823 }
 0x426   :  { %v1934_v45 = vpop.permute.xlu2 %1933 }
 0x427   :  { %v1936_v21 = vunpack.i.h.bf16 %v1934_v45  ;;  %v1935_v22 = vunpack.i.l.bf16 %v1934_v45 }
 0x431   :  { %v830_v54 = vpop.xlane.xlu0 %829 }
 0x432   :  { %2000 = vrcp.f32 %v830_v54 }
 0x435   :  { %850 = vadd.xlane.f32.xlu2 %v849_v2 }
 0x437   :  { %v842_v3 = vpop.xlane.xlu1 %841 }
 0x438   :  { %v2001_v38 = vpop.eup %2000 }
 0x439   :  { %v876_v5 = vmul.f32 %v2001_v38, %v2786_v48 }
 0x43b   :  { %1850 = vmatmul.msk.f32.vlgmr.msra.gmra.mxu2 %vm707_vm15, %v876_v5 }
 0x43f   :  { %v818_v46 = vpop.xlane.xlu1 %817 }
 0x440   :  { %2002 = vrcp.f32 %v818_v46 }
 0x446   :  { %v2003_v53 = vpop.eup %2002 }
 0x447   :  { %v872_v8 = vmul.f32 %v2003_v53, %v2799_v4  ;;  %v827_v6 = vpop.xlane.xlu0 %826  ;;  %v1228_v53 = vld [vmem:[#allocation14 + $0x18] sm:$0xff] }
 0x448   :  { %1257 = vmatpush.msrb.mxu2 %v1228_v53 }
 0x449   :  { %1846 = vmatmul.msk.f32.vlgmr.msra.gmra.mxu0 %vm707_vm15, %v872_v8  ;;  %v1227_v8 = vld [vmem:[#allocation14 + $0x10] sm:$0xff] }
 0x44a   :  { %1258 = vmatpush.msrb.mxu2 %v1227_v8 }
 0x44f   :  { %v833_v52 = vpop.xlane.xlu0 %832 }
 0x450   :  { %2004 = vrcp.f32 %v833_v52 }
 0x451   :  { %2006 = vrcp.f32 %v824_v10  ;;  %v1225_v10 = vld [vmem:[#allocation14] sm:$0xff] }
 0x452   :  { %2008 = vrcp.f32 %v827_v6  ;;  %v1226_v6 = vld [vmem:[#allocation14 + $0x8] sm:$0xff] }
 0x453   :  { %1259 = vmatpush.msrb.mxu2 %v1226_v6 }
 0x455   :  { %1260 = vmatpush.msrb.mxu2 %v1225_v10 }
 0x456   :  { %v2005_v11 = vpop.eup %2004 }
 0x457   :  { %v1929_v15 = vpop.permute.xlu1 %1928  ;;  %v877_v16 = vmul.f32 %v2005_v11, %v2809_v13  ;;  %v2007_v48 = vpop.eup %2006 }
 0x458   :  { %v1931_v17 = vunpack.i.h.bf16 %v1929_v15  ;;  %v1930_v18 = vunpack.i.l.bf16 %v1929_v15  ;;  %v874_v4 = vmul.f32 %v2007_v48, %v2780_v33  ;;  %v2009_v7 = vpop.eup %2008 }
 0x459   :  { %1851 = vmatmul.msk.f32.gmra.mxu2 %vm707_vm15, %v877_v16  ;;  %v875_v13 = vmul.f32 %v2009_v7, %v2804_v9 }
 0x45a   :  { %1015 = vmatpush.msrb.mxu1 %v1930_v18  ;;  %1120 = vmatpush.msrb.mxu0 %v1931_v17 }
 0x45c   :  { %1016 = vmatpush.msrb.mxu1 %v1935_v22  ;;  %1121 = vmatpush.msrb.mxu0 %v1936_v21 }
 0x45d   :  { %1848 = vmatmul.msk.f32.vlgmr.msrb.gmra.mxu1 %vm707_vm15, %v874_v4 }
 0x45f   :  { %v821_v26 = vpop.xlane.xlu2 %820  ;;  %v848_v28 = vpop.xlane.xlu0 %847 }
 0x460   :  { %2010 = vrcp.f32 %v821_v26 }
 0x461   :  { %2012 = vrcp.f32 %v842_v3 }
 0x465   :  { %1849 = vmatmul.msk.f32.gmra.mxu1 %vm707_vm15, %v875_v13 }
 0x466   :  { %v2011_v19 = vpop.eup %2010 }
 0x467   :  { %v836_v27 = vpop.xlane.xlu2 %835  ;;  %v873_v29 = vmul.f32 %v2011_v19, %v2822_v34  ;;  %v2013_v33 = vpop.eup %2012 }
 0x468   :  { %2014 = vrcp.f32 %v836_v27  ;;  %v880_v50 = vmul.f32 %v2013_v33, %v2793_v61  ;;  %v1276_v33 = vld [vmem:[#allocation15 + $0x10] sm:$0xff] }
 0x469   :  { %1847 = vmatmul.msk.f32.gmra.mxu0 %vm707_vm15, %v873_v29  ;;  %2016 = vrcp.f32 %v848_v28  ;;  %v1277_v28 = vld [vmem:[#allocation15 + $0x18] sm:$0xff] }
 0x46e   :  { %v2015_v1 = vpop.eup %2014 }
 0x46f   :  { %v1939_v31 = vpop.permute.xlu2 %1938  ;;  %v2017_v36 = vpop.eup %2016  ;;  %v878_v39 = vmul.f32 %v2015_v1, %v2831_v37 }
 0x470   :  { %v1940_v47 = vunpack.i.l.bf16 %v1939_v31  ;;  %v1941_v49 = vunpack.i.h.bf16 %v1939_v31  ;;  %v882_v42 = vmul.f32 %v2017_v36, %v2824_v12  ;;  %v913_v12 = vpop.f32.mrf.mxu2 }
 0x471   :  { %1854 = vmatmul.msk.f32.vlgmr.msrb.gmra.mxu0 %vm707_vm15, %v880_v50 }
 0x472   :  { %v1944_v9 = vpop.permute.xlu0 %1943  ;;  %1085 = vmatpush.msra.mxu3 %v1940_v47 }
 0x473   :  { %v1945_v34 = vunpack.i.l.bf16 %v1944_v9  ;;  %v1946_v40 = vunpack.i.h.bf16 %v1944_v9 }
 0x474   :  { %1086 = vmatpush.msra.mxu3 %v1941_v49  ;;  %v948_v0 = vpop.f32.mrf.mxu3 }
 0x475   :  { %1155 = vmatpush.msra.mxu1 %v1945_v34  ;;  %1852 = vmatmul.msk.f32.vlgmr.msra.gmra.mxu3 %vm707_vm15, %v878_v39  ;;  %v1275_v39 = vld [vmem:[#allocation15 + $0x8] sm:$0xff]  ;;  %v1274_v34 = vld [vmem:[#allocation15] sm:$0xff] }
 0x476   :  { %1306 = vmatpush.msrb.mxu3 %v1277_v28 }
 0x477   :  { %1156 = vmatpush.msra.mxu1 %v1946_v40  ;;  %v1948_v40 = vld [vmem:[%s3100_s7] ss:$0 sm:$0xff] }
 0x478   :  { %1856 = vmatmul.msk.f32.vlgmr.msra.gmra.mxu1 %vm707_vm15, %v882_v42  ;;  %v916_v62 = vpop.f32.mrf.mxu2  ;;  %1307 = vmatpush.msrb.mxu3 %v1276_v33 }
 0x47a   :  { %1308 = vmatpush.msrb.mxu3 %v1275_v39  ;;  %v1358_v39 = vld [vmem:[#allocation17] sm:$0xff] }
 0x47c   :  { %1309 = vmatpush.msrb.mxu3 %v1274_v34 }
 0x482   :  { %v845_v61 = vpop.xlane.xlu1 %844 }
 0x483   :  { %2018 = vrcp.f32 %v845_v61 }
 0x489   :  { %v2019_v44 = vpop.eup %2018 }
 0x48a   :  { %v839_v30 = vpop.xlane.xlu1 %838  ;;  %v881_v23 = vmul.f32 %v2019_v44, %v2845_v20 }
 0x48b   :  { %2020 = vrcp.f32 %v839_v30 }
 0x48c   :  { %1855 = vmatmul.msk.f32.gmra.mxu0 %vm707_vm15, %v881_v23 }
 0x491   :  { %v2021_v37 = vpop.eup %2020 }
 0x492   :  { %v879_v57 = vmul.f32 %v2021_v37, %v2850_v55 }
 0x494   :  { %1853 = vmatmul.msk.f32.gmra.mxu3 %vm707_vm15, %v879_v57 }
 0x4a8   :  { %v851_v58 = vpop.xlane.xlu2 %850 }
 0x4a9   :  { %2022 = vrcp.f32 %v851_v58 }
 0x4af   :  { %v2023_v59 = vpop.eup %2022 }
 0x4b0   :  { %v883_v41 = vmul.f32 %v2023_v59, %v2855_v51  ;;  %v951_v51 = vpop.f32.mrf.mxu3 }
 0x4b2   :  { %1857 = vmatmul.msk.f32.gmra.mxu1 %vm707_vm15, %v883_v41 }
 0x4be   :  { %v1053_v56 = vpop.f32.mrf.mxu2 }
 0x4bf   :  { %1184 = vrot.lane.b32.xlu0 %v1053_v56, %s2390_s28 }
 0x4c6   :  { %v983_v20 = vpop.f32.mrf.mxu0 }
 0x4c7   :  { %1168 = vrot.lane.b32.xlu1 %v983_v20, %s2372_s30 }
 0x4da   :  { %v1018_v60 = vpop.f32.mrf.mxu1 }
 0x4db   :  { %1172 = vrot.lane.b32.xlu2 %v1018_v60, %s2372_s30 }
 0x4dc   :  { %v1056_v55 = vpop.f32.mrf.mxu2 }
 0x4dd   :  { %1186 = vrot.lane.b32.xlu0 %v1056_v55, %s2390_s28 }
 0x4e2   :  { %v1021_v2 = vpop.f32.mrf.mxu1 }
 0x4e6   :  { %v986_v43 = vpop.f32.mrf.mxu0 }
 0x4e7   :  { %1170 = vrot.lane.b32.xlu1 %v986_v43, %s2372_s30 }
 0x4ee   :  { %v1123_v63 = vpop.f32.mrf.mxu0 }
 0x4ef   :  { %1200 = vrot.lane.b32.xlu0 %v1123_v63, %s2391_s2 }
 0x4f5   :  { %v1158_v38 = vpop.f32.mrf.mxu1 }
 0x4f8   :  { %v1088_v54 = vpop.f32.mrf.mxu3 }
 0x4f9   :  { %1188 = vrot.lane.b32.xlu0 %v1088_v54, %s2390_s28 }
 0x501   :  { %1174 = vrot.lane.b32.xlu0 %v1021_v2, %s2372_s30 }
 0x509   :  { %v1126_v3 = vpop.f32.mrf.mxu0 }
 0x50a   :  { %1202 = vrot.lane.b32.xlu1 %v1126_v3, %s2391_s2 }
 0x512   :  { %1204 = vrot.lane.b32.xlu1 %v1158_v38, %s2391_s2 }
 0x517   :  { %v1091_v5 = vpop.f32.mrf.mxu3 }
 0x51a   :  { %1190 = vrot.lane.b32.xlu1 %v1091_v5, %s2390_s28 }
 0x52f   :  { %v1161_v46 = vpop.f32.mrf.mxu1 }
 0x530   :  { %1206 = vrot.lane.b32.xlu0 %v1161_v46, %s2391_s2 }
 0x531   :  { %v1185_v52 = vpop.permute.xlu0 %1184 }
 0x535   :  { %v1173_v7 = vpop.permute.xlu2 %1172 }
 0x536   :  { %v1214_v19 = vsel %vm430_vm14, %v948_v0, %v1173_v7 }
 0x539   :  { %v1169_v45 = vpop.permute.xlu1 %1168 }
 0x53a   :  { %v1212_v15 = vsel %vm430_vm14, %v913_v12, %v1169_v45  ;;  %v1949_v12 = vld [vmem:[%s3102_s9] ss:$0 sm:$0xff] }
 0x53b   :  { %v1216_v16 = vsel %vm707_vm15, %v1212_v15, %v1185_v52 }
 0x54f   :  { %v1187_v11 = vpop.permute.xlu0 %1186 }
 0x559   :  { %v1171_v18 = vpop.permute.xlu1 %1170 }
 0x55a   :  { %v1213_v21 = vsel %vm430_vm14, %v916_v62, %v1171_v18 }
 0x55b   :  { %v1217_v4 = vsel %vm707_vm15, %v1213_v21, %v1187_v11 }
 0x561   :  { %v1201_v48 = vpop.permute.xlu0 %1200 }
 0x562   :  { %v1221_v17 = vsel %vm1220_vm1, %v1216_v16, %v1201_v48 }
 0x563   :  { %1858 = vmatmul.msk.f32.vlgmr.msrb.gmra.mxu2 %vm241_vm0, %v1221_v17 }
 0x56b   :  { %v1189_v13 = vpop.permute.xlu0 %1188 }
 0x56c   :  { %v1218_v27 = vsel %vm707_vm15, %v1214_v19, %v1189_v13 }
 0x573   :  { %v1175_v1 = vpop.permute.xlu0 %1174 }
 0x574   :  { %v1215_v47 = vsel %vm430_vm14, %v951_v51, %v1175_v1 }
 0x57c   :  { %v1203_v22 = vpop.permute.xlu1 %1202 }
 0x57d   :  { %v1222_v26 = vsel %vm1220_vm1, %v1217_v4, %v1203_v22 }
 0x57e   :  { %1859 = vmatmul.msk.f32.gmra.mxu2 %vm241_vm0, %v1222_v26 }
 0x584   :  { %v1205_v29 = vpop.permute.xlu1 %1204 }
 0x585   :  { %v1223_v31 = vsel %vm1220_vm1, %v1218_v27, %v1205_v29 }
 0x586   :  { %1860 = vmatmul.msk.f32.gmra.mxu2 %vm241_vm0, %v1223_v31 }
 0x58c   :  { %v1191_v50 = vpop.permute.xlu1 %1190 }
 0x58d   :  { %v1219_v49 = vsel %vm707_vm15, %v1215_v47, %v1191_v50 }
 0x5a2   :  { %v1207_v9 = vpop.permute.xlu0 %1206 }
 0x5a3   :  { %v1224_v36 = vsel %vm1220_vm1, %v1219_v49, %v1207_v9  ;;  %v1361_v49 = vld [vmem:[#allocation17 + $0x18] sm:$0xff]  ;;  %v1360_v9 = vld [vmem:[#allocation17 + $0x10] sm:$0xff] }
 0x5a4   :  { %1861 = vmatmul.msk.f32.gmra.mxu2 %vm241_vm0, %v1224_v36  ;;  %1436 = vmatpush.msra.mxu0 %v1361_v49  ;;  %v1359_v36 = vld [vmem:[#allocation17 + $0x8] sm:$0xff] }
 0x5a6   :  { %1437 = vmatpush.msra.mxu0 %v1360_v9 }
 0x5a8   :  { %1438 = vmatpush.msra.mxu0 %v1359_v36 }
 0x5aa   :  { %1439 = vmatpush.msra.mxu0 %v1358_v39 }
 0x5e6   :  { %v1262_v42 = vpop.f32.mrf.mxu2 }
 0x5e7   :  { %v1263_v61 = vadd.f32 %v1948_v40, %v1262_v42 }
 0x5e9   :  { %1862 = vmatmul.msk.f32.vlgmr.msrb.gmra.mxu3 %vm241_vm0, %v1263_v61 }
 0x601   :  { %v1265_v44 = vpop.f32.mrf.mxu2 }
 0x602   :  { %v1266_v30 = vadd.f32 %v1948_v40, %v1265_v44 }
 0x604   :  { %1863 = vmatmul.msk.f32.gmra.mxu3 %vm241_vm0, %v1266_v30 }
 0x609   :  { %v1268_v23 = vpop.f32.mrf.mxu2 }
 0x60a   :  { %v1269_v37 = vadd.f32 %v1948_v40, %v1268_v23 }
 0x60c   :  { %1864 = vmatmul.msk.f32.gmra.mxu3 %vm241_vm0, %v1269_v37 }
 0x627   :  { %v1271_v57 = vpop.f32.mrf.mxu2 }
 0x628   :  { %v1272_v58 = vadd.f32 %v1948_v40, %v1271_v57  ;;  %v1572_v57 = vld [vmem:[#allocation20 + $0x18] sm:$0xff] }
 0x629   :  { %1647 = vmatpush.msrb.mxu0 %v1572_v57 }
 0x62a   :  { %1865 = vmatmul.msk.f32.gmra.mxu3 %vm241_vm0, %v1272_v58 }
 0x66c   :  { %v1311_v59 = vpop.f32.mrf.mxu3 }
 0x66d   :  { %v1312_v41 = vadd.f32 %v1949_v12, %v1311_v59 }
 0x66f   :  { %1323 = vst.msk [vmem:[#allocation2] sm:$0xff] %vm241_vm0, %v1312_v41 }
 0x687   :  { %v1314_v62 = vpop.f32.mrf.mxu3 }
 0x688   :  { %v1315_v56 = vadd.f32 %v1949_v12, %v1314_v62  ;;  %v1571_v62 = vld [vmem:[#allocation20 + $0x10] sm:$0xff] }
 0x689   :  { %1648 = vmatpush.msrb.mxu0 %v1571_v62 }
 0x68a   :  { %1324 = vst.msk [vmem:[#allocation2 + $0x8] sm:$0xff] %vm241_vm0, %v1315_v56 }
 0x68f   :  { %v1317_v20 = vpop.f32.mrf.mxu3 }
 0x690   :  { %v1318_v60 = vadd.f32 %v1949_v12, %v1317_v20 }
 0x691   :  { %v1331_v55 = vld [vmem:[#allocation2 + $0x1] ss:$2 sm:$0xff]  ;;  %v1327_v0 = vld [vmem:[#allocation2] ss:$2 sm:$0xff] }
 0x692   :  { %1325 = vst.msk [vmem:[#allocation2 + $0x10] sm:$0xff] %vm241_vm0, %v1318_v60  ;;  %1336 = vrot.lane.b32.xlu1 %v1331_v55, %s2390_s28  ;;  %1346 = vrot.lane.b32.xlu0 %v1327_v0, %s2386_s26  ;;  %v1570_v60 = vld [vmem:[#allocation20 + $0x8] sm:$0xff] }
 0x693   :  { %1649 = vmatpush.msrb.mxu0 %v1570_v60 }
 0x6ad   :  { %v1320_v43 = vpop.f32.mrf.mxu3 }
 0x6ae   :  { %v1321_v63 = vadd.f32 %v1949_v12, %v1320_v43  ;;  %v1569_v43 = vld [vmem:[#allocation20] sm:$0xff] }
 0x6af   :  { %1650 = vmatpush.msrb.mxu0 %v1569_v43  ;;  %v3007_v43 = vld [vmem:[%s3108_s15] sm:$0x3]  ;;  %s2392_s15 = smov [#allocation23]  }
 0x6b0   :  { %1326 = vst.msk [vmem:[#allocation2 + $0x18] sm:$0xff] %vm241_vm0, %v1321_v63  ;;  %s1785_s1 = sshll.u32 %s2392_s15, 4  ;;  %s1786_s1 = int_to_ptr.vmem [resolvable:$true] %s1785_s1 }
 0x6b7   :  { %v1333_v51 = vld [vmem:[#allocation2 + $0x11] ss:$2 sm:$0xff]  ;;  %v1329_v54 = vld [vmem:[#allocation2 + $0x10] ss:$2 sm:$0xff] }
 0x6b8   :  { %1338 = vrot.lane.b32.xlu2 %v1333_v51, %s2390_s28  ;;  %1348 = vrot.lane.b32.xlu1 %v1329_v54, %s2386_s26 }
 0x704   :  { %v1337_v2 = vpop.permute.xlu1 %1336  ;;  %v1347_v3 = vpop.permute.xlu0 %1346 }
 0x705   :  { %v1342_v38 = vsel %vm707_vm15, %v1327_v0, %v1337_v2  ;;  %v1352_v5 = vsel %vm707_vm15, %v1347_v3, %v1331_v55 }
 0x706   :  { %v2928_v46 = vadd.f32 %v1342_v38, %v2577_v24  ;;  %v2931_v53 = vadd.f32 %v1352_v5, %v2586_v32  ;;  %v2041_v5 = vld [vmem:[#allocation9] sm:$0xf] }
 0x708   :  { %v1367_v8 = vsel %vm241_vm0, %v2928_v46, 0.0  ;;  %v1578_v6 = vsel %vm241_vm0, %v2931_v53, 0.0 }
 0x709   :  { %1368 = vadd.xlane.f32.xlu2 %v1367_v8  ;;  %1579 = vadd.xlane.f32.xlu1 %v1578_v6  ;;  %v1414_v8 = vperm.slane %v2041_v5, 2 }
 0x712   :  { %v1339_v10 = vpop.permute.xlu2 %1338 }
 0x713   :  { %v1343_v52 = vsel %vm707_vm15, %v1329_v54, %v1339_v10  ;;  %v2040_v54 = vld [vmem:[#allocation8] sm:$0xf] }
 0x714   :  { %v2939_v11 = vadd.f32 %v1343_v52, %v2591_v35  ;;  %v1411_v2 = vperm.slane %v2040_v54, 2 }
 0x716   :  { %v1370_v24 = vsel %vm241_vm0, %v2939_v11, 0.0 }
 0x717   :  { %1371 = vadd.xlane.f32.xlu0 %v1370_v24 }
 0x72a   :  { %v1349_v32 = vpop.permute.xlu1 %1348 }
 0x72b   :  { %v1353_v45 = vsel %vm707_vm15, %v1349_v32, %v1333_v51 }
 0x72c   :  { %v2945_v15 = vadd.f32 %v1353_v45, %v2579_v25 }
 0x72e   :  { %v1581_v16 = vsel %vm241_vm0, %v2945_v15, 0.0 }
 0x72f   :  { %1582 = vadd.xlane.f32.xlu2 %v1581_v16 }
 0x77c   :  { %v1369_v48 = vpop.xlane.xlu2 %1368  ;;  %v1580_v17 = vpop.xlane.xlu1 %1579 }
 0x77d   :  { %v1373_v18 = vmul.f32 %v1369_v48, %v2545_v14  ;;  %v1584_v35 = vmul.f32 %v1580_v17, %v2545_v14 }
 0x77f   :  { %v2952_v21 = vsub.f32 %v2928_v46, %v1373_v18  ;;  %v2955_v22 = vsub.f32 %v2931_v53, %v1584_v35 }
 0x781   :  { %v1377_v25 = vmul.f32 %v2952_v21, %v2952_v21  ;;  %v1588_v4 = vmul.f32 %v2955_v22, %v2955_v22 }
 0x783   :  { %v1379_v26 = vsel %vm241_vm0, %v1377_v25, 0.0  ;;  %v1590_v7 = vsel %vm241_vm0, %v1588_v4, 0.0 }
 0x784   :  { %1380 = vadd.xlane.f32.xlu0 %v1379_v26  ;;  %1591 = vadd.xlane.f32.xlu2 %v1590_v7 }
 0x78a   :  { %v1372_v13 = vpop.xlane.xlu0 %1371 }
 0x78b   :  { %v1374_v19 = vmul.f32 %v1372_v13, %v2545_v14 }
 0x78d   :  { %v2965_v27 = vsub.f32 %v2939_v11, %v1374_v19  ;;  %v1622_v19 = vperm.slane %v2040_v54, 3 }
 0x78f   :  { %v1378_v29 = vmul.f32 %v2965_v27, %v2965_v27 }
 0x791   :  { %v1382_v28 = vsel %vm241_vm0, %v1378_v29, 0.0 }
 0x792   :  { %1383 = vadd.xlane.f32.xlu1 %v1382_v28 }
 0x7a2   :  { %v1583_v33 = vpop.xlane.xlu2 %1582 }
 0x7a3   :  { %v1585_v31 = vmul.f32 %v1583_v33, %v2545_v14 }
 0x7a5   :  { %v2972_v1 = vsub.f32 %v2945_v15, %v1585_v31 }
 0x7a7   :  { %v1589_v50 = vmul.f32 %v2972_v1, %v2972_v1 }
 0x7a9   :  { %v1593_v47 = vsel %vm241_vm0, %v1589_v50, 0.0  ;;  %v1625_v50 = vperm.slane %v2041_v5, 3  ;;  %v1364_v5 = vld [vmem:[#allocation18 + $0x10] sm:$0xff] }
 0x7aa   :  { %1594 = vadd.xlane.f32.xlu0 %v1593_v47 }
 0x7f7   :  { %v1592_v34 = vpop.xlane.xlu2 %1591  ;;  %v1381_v40 = vpop.xlane.xlu0 %1380 }
 0x7f8   :  { %v1596_v42 = vmul.f32 %v1592_v34, %v2545_v14  ;;  %v1385_v61 = vmul.f32 %v1381_v40, %v2545_v14 }
 0x7fa   :  { %v1387_v44 = vadd.f32 1e-05, %v1385_v61  ;;  %v1598_v30 = vadd.f32 1e-05, %v1596_v42  ;;  %v2992_v61 = vld [vmem:[%s3105_s12] sm:$0x3] }
 0x7fc   :  { %2024 = vrsqrt.f32 %v1387_v44  ;;  %vm1395_vm3 = vweird.f32 %v1387_v44  ;;  %vm1606_vm9 = vweird.f32 %v1598_v30 }
 0x7fd   :  { %2026 = vrsqrt.f32 %v1598_v30 }
 0x802   :  { %v2025_v23 = vpop.eup %2024 }
 0x803   :  { %v1390_v37 = vmul.f32 %v2025_v23, %v1387_v44  ;;  %v2027_v12 = vpop.eup %2026  ;;  %vm1396_vm2 = vweird.f32 %v2025_v23  ;;  %v1417_v44 = vperm.slane %v2992_v61, 0 }
 0x804   :  { %v1601_v55 = vmul.f32 %v2027_v12, %v1598_v30  ;;  %vm1397_vm4 = vmor %vm1395_vm3, %vm1396_vm2  ;;  %vm1607_vm6 = vweird.f32 %v2027_v12 }
 0x805   :  { %v1384_v58 = vpop.xlane.xlu1 %1383  ;;  %v1391_v59 = vmul.f32 %v2025_v23, %v1390_v37  ;;  %vm1608_vm10 = vmor %vm1606_vm9, %vm1607_vm6 }
 0x806   :  { %v1386_v41 = vmul.f32 %v1384_v58, %v2545_v14  ;;  %v1602_v51 = vmul.f32 %v2027_v12, %v1601_v55 }
 0x807   :  { %v1392_v56 = vmul.f32 0.5, %v1391_v59 }
 0x808   :  { %v1388_v20 = vadd.f32 1e-05, %v1386_v41  ;;  %v1603_v10 = vmul.f32 0.5, %v1602_v51  ;;  %v1365_v51 = vld [vmem:[#allocation18 + $0x18] sm:$0xff] }
 0x809   :  { %v1393_v0 = vsub.f32 1.5, %v1392_v56  ;;  %1554 = vmatpush.msrb.mxu1 %v1365_v51  ;;  %v1576_v51 = vld [vmem:[#allocation21 + $0x18] sm:$0xff] }
 0x80a   :  { %2028 = vrsqrt.f32 %v1388_v20  ;;  %v1604_v16 = vsub.f32 1.5, %v1603_v10  ;;  %vm1405_vm7 = vweird.f32 %v1388_v20  ;;  %v1363_v10 = vld [vmem:[#allocation18 + $0x8] sm:$0xff] }
 0x80b   :  { %v1394_v63 = vmul.f32 %v2025_v23, %v1393_v0  ;;  %1555 = vmatpush.msrb.mxu1 %v1364_v5 }
 0x80c   :  { %v1605_v18 = vmul.f32 %v2027_v12, %v1604_v16 }
 0x80d   :  { %v1398_v3 = vsel %vm1397_vm4, %v2025_v23, %v1394_v63  ;;  %1556 = vmatpush.msrb.mxu1 %v1363_v10  ;;  %v1575_v10 = vld [vmem:[#allocation21 + $0x10] sm:$0xff] }
 0x80e   :  { %v1409_v38 = vmul.f32 %v1398_v3, %v2952_v21  ;;  %v1609_v4 = vsel %vm1608_vm10, %v2027_v12, %v1605_v18 }
 0x80f   :  { %v1620_v29 = vmul.f32 %v1609_v4, %v2955_v22 }
 0x810   :  { %v2029_v6 = vpop.eup %2028  ;;  %v1412_v52 = vmul.f32 %v1411_v2, %v1409_v38  ;;  %v1628_v38 = vperm.slane %v3007_v43, 0 }
 0x811   :  { %v1400_v24 = vmul.f32 %v2029_v6, %v1388_v20  ;;  %vm1406_vm5 = vweird.f32 %v2029_v6  ;;  %v1623_v31 = vmul.f32 %v1622_v19, %v1620_v29 }
 0x812   :  { %v1415_v45 = vadd.f32 %v1414_v8, %v1412_v52  ;;  %vm1407_vm8 = vmor %vm1405_vm7, %vm1406_vm5 }
 0x813   :  { %v1401_v32 = vmul.f32 %v2029_v6, %v1400_v24  ;;  %v1626_v49 = vadd.f32 %v1625_v50, %v1623_v31 }
 0x814   :  { %1866 = vmatmul.msk.f32.vlgmr.msra.gmra.mxu0 %vm241_vm0, %v1415_v45 }
 0x815   :  { %v1402_v48 = vmul.f32 0.5, %v1401_v32 }
 0x817   :  { %v1403_v17 = vsub.f32 1.5, %v1402_v48 }
 0x819   :  { %v1404_v35 = vmul.f32 %v2029_v6, %v1403_v17  ;;  %v1362_v17 = vld [vmem:[#allocation18] sm:$0xff] }
 0x81a   :  { %1557 = vmatpush.msrb.mxu1 %v1362_v17 }
 0x81b   :  { %v1408_v21 = vsel %vm1407_vm8, %v2029_v6, %v1404_v35 }
 0x81c   :  { %v1410_v25 = vmul.f32 %v1408_v21, %v2965_v27  ;;  %1765 = vmatpush.msra.mxu1 %v1576_v51 }
 0x81d   :  { %v1595_v26 = vpop.xlane.xlu0 %1594 }
 0x81e   :  { %v1597_v7 = vmul.f32 %v1595_v26, %v2545_v14  ;;  %v1413_v13 = vmul.f32 %v1411_v2, %v1410_v25  ;;  %1766 = vmatpush.msra.mxu1 %v1575_v10 }
 0x820   :  { %v1599_v28 = vadd.f32 1e-05, %v1597_v7  ;;  %v1416_v33 = vadd.f32 %v1414_v8, %v1413_v13 }
 0x822   :  { %2030 = vrsqrt.f32 %v1599_v28  ;;  %1867 = vmatmul.msk.f32.gmra.mxu0 %vm241_vm0, %v1416_v33  ;;  %vm1616_vm12 = vweird.f32 %v1599_v28 }
 0x828   :  { %v2031_v47 = vpop.eup %2030 }
 0x829   :  { %v1611_v9 = vmul.f32 %v2031_v47, %v1599_v28  ;;  %vm1617_vm11 = vweird.f32 %v2031_v47 }
 0x82a   :  { %1872 = vmatmul.msk.f32.vlgmr.msrb.gmra.mxu0 %vm241_vm0, %v1626_v49  ;;  %vm1618_vm13 = vmor %vm1616_vm12, %vm1617_vm11 }
 0x82b   :  { %v1612_v27 = vmul.f32 %v2031_v47, %v1611_v9 }
 0x82d   :  { %v1613_v36 = vmul.f32 0.5, %v1612_v27 }
 0x82f   :  { %v1614_v39 = vsub.f32 1.5, %v1613_v36 }
 0x831   :  { %v1615_v14 = vmul.f32 %v2031_v47, %v1614_v39 }
 0x833   :  { %v1619_v22 = vsel %vm1618_vm13, %v2031_v47, %v1615_v14 }
 0x834   :  { %v1621_v34 = vmul.f32 %v1619_v22, %v2972_v1 }
 0x836   :  { %v1624_v40 = vmul.f32 %v1622_v19, %v1621_v34 }
 0x838   :  { %v1627_v42 = vadd.f32 %v1625_v50, %v1624_v40 }
 0x83a   :  { %1873 = vmatmul.msk.f32.gmra.mxu0 %vm241_vm0, %v1627_v42 }
 0x891   :  { %v1441_v30 = vpop.f32.mrf.mxu0 }
 0x892   :  { %v2995_v23 = vadd.f32 %v1441_v30, %v1417_v44 }
 0x894   :  { %v2998_v37 = vmul.f32 0.70710677, %v2995_v23 }
 0x896   :  { %v1451_v1 = vmul.f32 %v2998_v37, %v2998_v37 }
 0x898   :  { %v1452_v57 = vmin.f32 %v1451_v1, 16.0 }
 0x89a   :  { %v1453_v58 = vmul.f32 2.1237322e-06, %v1452_v57  ;;  %v1464_v12 = vmul.f32 3.8918573e-05, %v1452_v57 }
 0x89c   :  { %v1454_v59 = vadd.f32 0.00028619796, %v1453_v58  ;;  %v1465_v41 = vadd.f32 0.001143296, %v1464_v12 }
 0x89e   :  { %v1455_v62 = vmul.f32 %v1454_v59, %v1452_v57  ;;  %v1466_v56 = vmul.f32 %v1465_v41, %v1452_v57 }
 0x89f   :  { %v1444_v20 = vpop.f32.mrf.mxu0 }
 0x8a0   :  { %v3002_v60 = vadd.f32 %v1444_v20, %v1417_v44  ;;  %v1456_v55 = vadd.f32 0.0036580483, %v1455_v62  ;;  %v1467_v0 = vadd.f32 0.014752088, %v1466_v56 }
 0x8a2   :  { %v3010_v63 = vmul.f32 0.70710677, %v3002_v60  ;;  %v1457_v54 = vmul.f32 %v1456_v55, %v1452_v57  ;;  %v1468_v2 = vmul.f32 %v1467_v0, %v1452_v57 }
 0x8a4   :  { %v1491_v3 = vmul.f32 %v3010_v63, %v3010_v63  ;;  %v1469_v8 = vadd.f32 0.112945676, %v1468_v2  ;;  %v1458_v52 = vadd.f32 0.05243302, %v1457_v54 }
 0x8a6   :  { %v3015_v6 = vmin.f32 %v1491_v3, 16.0  ;;  %v1470_v24 = vmul.f32 %v1469_v8, %v1452_v57  ;;  %v1459_v26 = vmul.f32 %v1458_v52, %v1452_v57 }
 0x8a7   :  { %v1652_v32 = vpop.f32.mrf.mxu0 }
 0x8a8   :  { %v1493_v45 = vmul.f32 2.1237322e-06, %v3015_v6  ;;  %v1504_v16 = vmul.f32 3.8918573e-05, %v3015_v6  ;;  %v3019_v48 = vadd.f32 %v1652_v32, %v1628_v38  ;;  %v1471_v18 = vadd.f32 0.4994258, %v1470_v24 }
 0x8a9   :  { %v1460_v31 = vadd.f32 0.18741608, %v1459_v26 }
 0x8aa   :  { %v1494_v35 = vadd.f32 0.00028619796, %v1493_v45  ;;  %v1505_v21 = vadd.f32 0.001143296, %v1504_v16  ;;  %v1472_v25 = vmul.f32 %v1471_v18, %v1452_v57  ;;  %v3022_v4 = vmul.f32 0.70710677, %v3019_v48 }
 0x8ab   :  { %v1461_v39 = vmul.f32 %v1460_v31, %v1452_v57  ;;  %v1574_v16 = vld [vmem:[#allocation21 + $0x8] sm:$0xff] }
 0x8ac   :  { %v1495_v7 = vmul.f32 %v1494_v35, %v3015_v6  ;;  %v1506_v13 = vmul.f32 %v1505_v21, %v3015_v6  ;;  %v1473_v19 = vadd.f32 1.0, %v1472_v25  ;;  %v1662_v29 = vmul.f32 %v3022_v4, %v3022_v4  ;;  %1767 = vmatpush.msra.mxu1 %v1574_v16  ;;  %v1573_v25 = vld [vmem:[#allocation21] sm:$0xff] }
 0x8ad   :  { %v1462_v59 = vadd.f32 1.1283791, %v1461_v39 }
 0x8ae   :  { %v1496_v28 = vadd.f32 0.0036580483, %v1495_v7  ;;  %v1507_v33 = vadd.f32 0.014752088, %v1506_v13  ;;  %2032 = vrcp.f32 %v1473_v19  ;;  %v3029_v47 = vmin.f32 %v1662_v29, 16.0  ;;  %1768 = vmatpush.msra.mxu1 %v1573_v25 }
 0x8af   :  { %v1485_v57 = vand.u32 2147483648, %v1473_v19  ;;  %v1483_v2 = vand.u32 2147483647, %v1473_v19  ;;  %vm1479_vm15 = vweird.f32 %v1473_v19  ;;  %v1463_v17 = vmul.f32 %v1462_v59, %v2998_v37 }
 0x8b0   :  { %v1508_v50 = vmul.f32 %v1507_v33, %v3015_v6  ;;  %v1497_v49 = vmul.f32 %v1496_v28, %v3015_v6  ;;  %v1664_v27 = vmul.f32 2.1237322e-06, %v3029_v47  ;;  %v1675_v36 = vmul.f32 3.8918573e-05, %v3029_v47 }
 0x8b1   :  { %vm1484_vm2 = vcmp.eq.f32.partialorder %v1483_v2, 8.507059e+37 }
 0x8b2   :  { %v1509_v9 = vadd.f32 0.112945676, %v1508_v50  ;;  %v1498_v34 = vadd.f32 0.05243302, %v1497_v49  ;;  %v1665_v40 = vadd.f32 0.00028619796, %v1664_v27 }
 0x8b3   :  { %v1676_v42 = vadd.f32 0.001143296, %v1675_v36 }
 0x8b4   :  { %v1510_v14 = vmul.f32 %v1509_v9, %v3015_v6  ;;  %v2033_v22 = vpop.eup %2032  ;;  %v1666_v1 = vmul.f32 %v1665_v40, %v3029_v47  ;;  %v1499_v20 = vmul.f32 %v1498_v34, %v3015_v6  ;;  %v1447_v9 = vmul.f32 0.5, %v2995_v23 }
 0x8b5   :  { %v1475_v44 = vmul.f32 %v2033_v22, %v1473_v19  ;;  %v1677_v58 = vmul.f32 %v1676_v42, %v3029_v47  ;;  %vm1480_vm14 = vweird.f32 %v2033_v22 }
 0x8b6   :  { %v1511_v30 = vadd.f32 0.4994258, %v1510_v14  ;;  %v1667_v55 = vadd.f32 0.0036580483, %v1666_v1  ;;  %vm1481_vm1 = vmor %vm1479_vm15, %vm1480_vm14  ;;  %v1500_v24 = vadd.f32 0.18741608, %v1499_v20 }
 0x8b7   :  { %v1655_v12 = vpop.f32.mrf.mxu0  ;;  %v1476_v41 = vsub.f32 1.0, %v1475_v44  ;;  %v1678_v0 = vadd.f32 0.014752088, %v1677_v58 }
 0x8b8   :  { %v1512_v62 = vmul.f32 %v1511_v30, %v3015_v6  ;;  %v3038_v56 = vadd.f32 %v1655_v12, %v1628_v38  ;;  %v1486_v38 = vor.u32 1.1754944e-38, %v1485_v57  ;;  %v1668_v32 = vmul.f32 %v1667_v55, %v3029_v47 }
 0x8b9   :  { %v1477_v54 = vmul.f32 %v2033_v22, %v1476_v41  ;;  %v1679_v5 = vmul.f32 %v1678_v0, %v3029_v47  ;;  %v1501_v19 = vmul.f32 %v1500_v24, %v3015_v6 }
 0x8ba   :  { %v1513_v3 = vadd.f32 1.0, %v1512_v62  ;;  %v3043_v8 = vmul.f32 0.70710677, %v3038_v56  ;;  %v1669_v29 = vadd.f32 0.05243302, %v1668_v32  ;;  %v1448_v32 = vmul.f32 0.5, %v3002_v60 }
 0x8bb   :  { %v1478_v52 = vadd.f32 %v2033_v22, %v1477_v54  ;;  %v1680_v35 = vadd.f32 0.112945676, %v1679_v5  ;;  %v1502_v14 = vadd.f32 1.1283791, %v1501_v19 }
 0x8bc   :  { %2034 = vrcp.f32 %v1513_v3  ;;  %v1702_v45 = vmul.f32 %v3043_v8, %v3043_v8  ;;  %v1525_v34 = vand.u32 2147483648, %v1513_v3  ;;  %v1670_v42 = vmul.f32 %v1669_v29, %v3029_v47 }
 0x8bd   :  { %v1482_v18 = vsel %vm1481_vm1, %v2033_v22, %v1478_v52  ;;  %v1681_v7 = vmul.f32 %v1680_v35, %v3029_v47  ;;  %v1523_v58 = vand.u32 2147483647, %v1513_v3  ;;  %vm1519_vm4 = vweird.f32 %v1513_v3 }
 0x8be   :  { %v1487_v21 = vsel %vm1484_vm2, %v1486_v38, %v1482_v18  ;;  %v3050_v13 = vmin.f32 %v1702_v45, 16.0  ;;  %v1526_v41 = vor.u32 1.1754944e-38, %v1525_v34  ;;  %v1671_v62 = vadd.f32 0.18741608, %v1670_v42 }
 0x8bf   :  { %v1488_v26 = vmul.f32 %v1487_v21, %v1463_v17  ;;  %v1682_v31 = vadd.f32 0.4994258, %v1681_v7  ;;  %v1503_v20 = vmul.f32 %v1502_v14, %v3010_v63  ;;  %vm1524_vm6 = vcmp.eq.f32.partialorder %v1523_v58, 8.507059e+37 }
 0x8c0   :  { %v1704_v37 = vmul.f32 2.1237322e-06, %v3050_v13  ;;  %v1715_v49 = vmul.f32 3.8918573e-05, %v3050_v13  ;;  %v1672_v10 = vmul.f32 %v1671_v62, %v3029_v47  ;;  %v1535_v62 = vperm.slane %v2992_v61, 1 }
 0x8c1   :  { %v1868_v33 = vclamps-f32 %v1488_v26, 1.0  ;;  %v1683_v36 = vmul.f32 %v1682_v31, %v3029_v47 }
 0x8c2   :  { %v2035_v28 = vpop.eup %2034  ;;  %v1705_v39 = vadd.f32 0.00028619796, %v1704_v37  ;;  %v1716_v40 = vadd.f32 0.001143296, %v1715_v49  ;;  %v1673_v16 = vadd.f32 1.1283791, %v1672_v10 }
 0x8c3   :  { %v1515_v50 = vmul.f32 %v2035_v28, %v1513_v3  ;;  %v1531_v27 = vadd.f32 1.0, %v1868_v33  ;;  %v1684_v44 = vadd.f32 1.0, %v1683_v36  ;;  %vm1520_vm3 = vweird.f32 %v2035_v28 }
 0x8c4   :  { %v1706_v30 = vmul.f32 %v1705_v39, %v3050_v13  ;;  %v1717_v12 = vmul.f32 %v1716_v40, %v3050_v13  ;;  %vm1521_vm5 = vmor %vm1519_vm4, %vm1520_vm3  ;;  %v1674_v60 = vmul.f32 %v1673_v16, %v3022_v4 }
 0x8c5   :  { %v1516_v22 = vsub.f32 1.0, %v1515_v50  ;;  %v1533_v6 = vmul.f32 %v1531_v27, %v1447_v9  ;;  %2036 = vrcp.f32 %v1684_v44  ;;  %v1696_v17 = vand.u32 2147483648, %v1684_v44 }
 0x8c6   :  { %v1718_v59 = vadd.f32 0.014752088, %v1717_v12  ;;  %v1707_v57 = vadd.f32 0.0036580483, %v1706_v30  ;;  %v1694_v25 = vand.u32 2147483647, %v1684_v44  ;;  %vm1690_vm8 = vweird.f32 %v1684_v44 }
 0x8c7   :  { %v1517_v1 = vmul.f32 %v2035_v28, %v1516_v22  ;;  %1870 = vmatmul.msk.f32.vlgmr.msrb.gmra.mxu1 %vm241_vm0, %v1533_v6  ;;  %v1697_v29 = vor.u32 1.1754944e-38, %v1696_v17  ;;  %v1658_v27 = vmul.f32 0.5, %v3019_v48 }
 0x8c8   :  { %v1719_v0 = vmul.f32 %v1718_v59, %v3050_v13  ;;  %v1708_v52 = vmul.f32 %v1707_v57, %v3050_v13  ;;  %vm1695_vm10 = vcmp.eq.f32.partialorder %v1694_v25, 8.507059e+37 }
 0x8c9   :  { %v1518_v23 = vadd.f32 %v2035_v28, %v1517_v1 }
 0x8ca   :  { %v1720_v2 = vadd.f32 0.112945676, %v1719_v0  ;;  %v1709_v18 = vadd.f32 0.05243302, %v1708_v52 }
 0x8cb   :  { %v1522_v55 = vsel %vm1521_vm5, %v2035_v28, %v1518_v23  ;;  %v2037_v5 = vpop.eup %2036  ;;  %v1659_v23 = vmul.f32 0.5, %v3038_v56  ;;  %v1746_v56 = vperm.slane %v3007_v43, 1 }
 0x8cc   :  { %v1527_v51 = vsel %vm1524_vm6, %v1526_v41, %v1522_v55  ;;  %v1686_v3 = vmul.f32 %v2037_v5, %v1684_v44  ;;  %v1721_v38 = vmul.f32 %v1720_v2, %v3050_v13  ;;  %vm1691_vm7 = vweird.f32 %v2037_v5 }
 0x8cd   :  { %v1528_v54 = vmul.f32 %v1527_v51, %v1503_v20  ;;  %vm1692_vm9 = vmor %vm1690_vm8, %vm1691_vm7  ;;  %v1710_v28 = vmul.f32 %v1709_v18, %v3050_v13 }
 0x8ce   :  { %v1687_v45 = vsub.f32 1.0, %v1686_v3  ;;  %v1722_v63 = vadd.f32 0.4994258, %v1721_v38 }
 0x8cf   :  { %v1869_v24 = vclamps-f32 %v1528_v54, 1.0  ;;  %v1711_v50 = vadd.f32 0.18741608, %v1710_v28 }
 0x8d0   :  { %v1688_v21 = vmul.f32 %v2037_v5, %v1687_v45  ;;  %v1723_v26 = vmul.f32 %v1722_v63, %v3050_v13 }
 0x8d1   :  { %v1532_v35 = vadd.f32 1.0, %v1869_v24  ;;  %v1712_v39 = vmul.f32 %v1711_v50, %v3050_v13 }
 0x8d2   :  { %v1689_v7 = vadd.f32 %v2037_v5, %v1688_v21  ;;  %v1724_v19 = vadd.f32 1.0, %v1723_v26 }
 0x8d3   :  { %v1534_v47 = vmul.f32 %v1532_v35, %v1448_v32  ;;  %v1713_v4 = vadd.f32 1.1283791, %v1712_v39 }
 0x8d4   :  { %v1693_v33 = vsel %vm1692_vm9, %v2037_v5, %v1689_v7  ;;  %2038 = vrcp.f32 %v1724_v19  ;;  %v1736_v40 = vand.u32 2147483648, %v1724_v19  ;;  %v1734_v42 = vand.u32 2147483647, %v1724_v19 }
 0x8d5   :  { %1871 = vmatmul.msk.f32.gmra.mxu1 %vm241_vm0, %v1534_v47  ;;  %v1698_v31 = vsel %vm1695_vm10, %v1697_v29, %v1693_v33  ;;  %vm1730_vm12 = vweird.f32 %v1724_v19  ;;  %v1714_v1 = vmul.f32 %v1713_v4, %v3043_v8 }
 0x8d6   :  { %v1699_v37 = vmul.f32 %v1698_v31, %v1674_v60  ;;  %v1737_v30 = vor.u32 1.1754944e-38, %v1736_v40  ;;  %vm1735_vm14 = vcmp.eq.f32.partialorder %v1734_v42, 8.507059e+37 }
 0x8d8   :  { %v1874_v49 = vclamps-f32 %v1699_v37, 1.0 }
 0x8da   :  { %v2039_v9 = vpop.eup %2038  ;;  %v1742_v36 = vadd.f32 1.0, %v1874_v49 }
 0x8db   :  { %v1726_v14 = vmul.f32 %v2039_v9, %v1724_v19  ;;  %vm1731_vm11 = vweird.f32 %v2039_v9 }
 0x8dc   :  { %v1744_v22 = vmul.f32 %v1742_v36, %v1658_v27  ;;  %vm1732_vm13 = vmor %vm1730_vm12, %vm1731_vm11 }
 0x8dd   :  { %v1727_v34 = vsub.f32 1.0, %v1726_v14 }
 0x8de   :  { %1876 = vmatmul.msk.f32.vlgmr.msra.gmra.mxu1 %vm241_vm0, %v1744_v22 }
 0x8df   :  { %v1728_v6 = vmul.f32 %v2039_v9, %v1727_v34 }
 0x8e1   :  { %v1729_v44 = vadd.f32 %v2039_v9, %v1728_v6 }
 0x8e3   :  { %v1733_v48 = vsel %vm1732_vm13, %v2039_v9, %v1729_v44 }
 0x8e4   :  { %v1738_v58 = vsel %vm1735_vm14, %v1737_v30, %v1733_v48 }
 0x8e5   :  { %v1739_v13 = vmul.f32 %v1738_v58, %v1714_v1 }
 0x8e7   :  { %v1875_v12 = vclamps-f32 %v1739_v13, 1.0 }
 0x8e9   :  { %v1743_v59 = vadd.f32 1.0, %v1875_v12 }
 0x8eb   :  { %v1745_v41 = vmul.f32 %v1743_v59, %v1659_v23 }
 0x8ed   :  { %1877 = vmatmul.msk.f32.gmra.mxu1 %vm241_vm0, %v1745_v41 }
 0x944   :  { %v1559_v57 = vpop.f32.mrf.mxu1 }
 0x945   :  { %v1560_v20 = vadd.f32 %v1559_v57, %v1535_v62 }
 0x947   :  { %v1565_v55 = vadd.f32 %v1560_v20, %v2928_v46 }
 0x949   :  { %1567 = vst.msk [vmem:[#allocation23] sm:$0xff] %vm241_vm0, %v1565_v55 }
 0x952   :  { %v1562_v8 = vpop.f32.mrf.mxu1 }
 0x953   :  { %v1563_v0 = vadd.f32 %v1562_v8, %v1535_v62 }
 0x955   :  { %v1566_v51 = vadd.f32 %v1563_v0, %v2939_v11 }
 0x957   :  { %1568 = vst.msk [vmem:[#allocation23 + $0x8] sm:$0xff] %vm241_vm0, %v1566_v51 }
 0x95b   :  { %v1770_v54 = vpop.f32.mrf.mxu1 }
 0x95c   :  { %v1771_v2 = vadd.f32 %v1770_v54, %v1746_v56 }
 0x95e   :  { %v1776_v5 = vadd.f32 %v1771_v2, %v2931_v53 }
 0x960   :  { %1779 = vst.msk [vmem:[#allocation23 + $0x10] sm:$0xff] %vm241_vm0, %v1776_v5 }
 0x96a   :  { %v1773_v61 = vpop.f32.mrf.mxu1 }
 0x96b   :  { %v1774_v46 = vadd.f32 %v1773_v61, %v1746_v56 }
 0x96d   :  { %v1777_v11 = vadd.f32 %v1774_v46, %v2945_v15 }
 0x96f   :  { %1780 = vst.msk [vmem:[#allocation23 + $0x18] sm:$0xff] %vm241_vm0, %v1777_v11 }
 0x970   :  { %1793 = dma.vmem_to_hbm [thread:$0]  %s1786_s1, 512, %s1788_s20, [#allocation5], %s2371_s29, %s2371_s29, %s2372_s30  }
 0x971   :  { %2368 = dma.done.wait [#allocation5], 512  }
 0x972   :  { %2369 = vsyncadd [#allocation5], 4294966784 }
 0x973   :  { %1798 = vsyncpa [#allocation4], 1 }
 0x974   :  { %1799 = vsyncpa [#allocation7], 1 }
 0x975   :  { %1800 = vsyncpa [#allocation10], 1 }
 0x976   :  { %1801 = vsyncpa [#allocation13], 1 }
 0x977   :  { %1802 = vsyncpa [#allocation16], 1 }
 0x978   :  { %1803 = vsyncpa [#allocation19], 1 }
 0x979   :  { %1804 = vsyncpa [#allocation22], 1 }
 0x97a   :  { %1805 = vsyncpa [#allocation5], 1 }

</bundles_post_ra>
